<compile_context>
chip_gen: v5e
topology: v5e:2x2
jax: 0.10.0
libtpu: 0.0.40
codegen_flags: <defaults>
</compile_context>

<pallas_src>
from functools import partial

import jax
import jax.numpy as jnp
from jax.experimental import pallas as pl
from jax.experimental.pallas import tpu as pltpu


def _pick_vmem_limit():
    try:
        cap = getattr(pltpu.get_tpu_info(), "vmem_capacity_bytes", None)
    except Exception:
        cap = None
    if cap is None:
        return 32 * 1024 * 1024
    return int(min(cap // 2, 64 * 1024 * 1024))


# ---------------------------------------------------------------------------
# Prologue: LayerNorm + KV projection + K-RoPE for the whole sequence (run once).
# ---------------------------------------------------------------------------
def _kv_proj_kernel(x_ref, gamma_ref, wkv_ref, cosk_ref, sink_ref, k_ref, v_ref,
                    *, dim_head, eps):
    half = dim_head // 2
    cd = wkv_ref.dtype                                   # MXU compute dtype (bf16 here)
    x = x_ref[0].astype(jnp.float32)
    mu = jnp.mean(x, axis=-1, keepdims=True)
    var = jnp.mean(jnp.square(x - mu), axis=-1, keepdims=True)
    xn = (x - mu) * jax.lax.rsqrt(var + eps) * gamma_ref[...].astype(jnp.float32)
    kv = jnp.dot(xn.astype(cd), wkv_ref[...], preferred_element_type=jnp.float32)
    k = kv[:, :dim_head]
    v = kv[:, dim_head:]
    # rotate_half folded into signed sin table; one XLU roll.
    k = k * cosk_ref[...] + pltpu.roll(k, shift=half, axis=1) * sink_ref[...]
    k_ref[0] = k.astype(k_ref.dtype)
    v_ref[0] = v.astype(v_ref.dtype)


# ---------------------------------------------------------------------------
# Main flash-style attention kernel over a flattened lower-triangular schedule.
# ---------------------------------------------------------------------------
def _attn_kernel(iq_tab, ik_tab, last_tab,
                 xq_ref, gamma_ref, wq_ref, wo_ref, cosq_ref, sinq_ref, k_ref, v_ref,
                 o_ref,
                 q_s, m_s, l_s, acc_s,
                 *, heads, dim_head, eps, tq, tk):
    s = pl.program_id(1)
    iq = iq_tab[s]
    ik = ik_tab[s]
    half = dim_head // 2
    cd = wq_ref.dtype

    is_first = ik == 0                               # first KV tile of this q row
    is_last = last_tab[s] != 0                       # last KV tile of this q row
    needs_mask = ik * tk + tk - 1 > iq * tq          # KV tile crosses the diagonal

    # ---- once per q-tile row: LayerNorm + Q projection + RoPE + scale ----
    @pl.when(is_first)
    def _proj_q():
        x = xq_ref[0].astype(jnp.float32)
        mu = jnp.mean(x, axis=-1, keepdims=True)
        var = jnp.mean(jnp.square(x - mu), axis=-1, keepdims=True)
        xn = (x - mu) * jax.lax.rsqrt(var + eps) * gamma_ref[...].astype(jnp.float32)
        q = jnp.dot(xn.astype(cd), wq_ref[...], preferred_element_type=jnp.float32)
        cq = cosq_ref[...]                                    # q-scale folded in
        sq = sinq_ref[...]                                    # q-scale + sign folded in
        for h in range(heads):
            qh = q[:, h * dim_head:(h + 1) * dim_head]        # 128-aligned slice
            qh = qh * cq + pltpu.roll(qh, shift=half, axis=1) * sq
            q_s[h * tq:(h + 1) * tq, :] = qh.astype(q_s.dtype)

    # ---- one KV tile of online softmax (heads flattened into the M dim) ----
    def attend(first, masked):
        k = k_ref[0]                                          # (tk, dh) bf16 (roped)
        v = v_ref[0]                                          # (tk, dh) bf16
        sim = jax.lax.dot_general(q_s[...], k, (((1,), (1,)), ((), ())),
                                  preferred_element_type=jnp.float32)   # (heads*tq, tk) f32
        if masked:
            row = jax.lax.broadcasted_iota(jnp.int32, (heads * tq, tk), 0)
            col = jax.lax.broadcasted_iota(jnp.int32, (heads * tq, tk), 1)
            q_local = jnp.bitwise_and(row, tq - 1)            # tq is a power of two
            keep = col <= q_local + (iq * tq - ik * tk)       # absolute seq indices
            sim = jnp.where(keep, sim, -1e30)                 # sim stays f32
        m_tile = jnp.max(sim, axis=-1, keepdims=True)
        if first:
            m_new = m_tile
            p = jnp.exp(sim - m_new)
            l_s[...] = jnp.sum(p, axis=-1, keepdims=True)
            acc_s[...] = jnp.dot(p.astype(cd), v, preferred_element_type=jnp.float32)
        else:
            m_prev = m_s[...]
            m_new = jnp.maximum(m_prev, m_tile)
            alpha = jnp.exp(m_prev - m_new)
            p = jnp.exp(sim - m_new)
            l_s[...] = alpha * l_s[...] + jnp.sum(p, axis=-1, keepdims=True)
            acc_s[...] = alpha * acc_s[...] + jnp.dot(p.astype(cd), v,
                                                      preferred_element_type=jnp.float32)
        m_s[...] = m_new

    @pl.when(jnp.logical_and(is_first, needs_mask))
    def _a():
        attend(first=True, masked=True)

    @pl.when(jnp.logical_and(is_first, jnp.logical_not(needs_mask)))
    def _b():
        attend(first=True, masked=False)

    @pl.when(jnp.logical_and(jnp.logical_not(is_first), needs_mask))
    def _c():
        attend(first=False, masked=True)

    @pl.when(jnp.logical_and(jnp.logical_not(is_first), jnp.logical_not(needs_mask)))
    def _d():
        attend(first=False, masked=False)

    # ---- finalize on the last KV tile: normalize + per-head output projection ----
    @pl.when(is_last)
    def _finalize():
        outn = acc_s[...] * pl.reciprocal(l_s[...], approx=True)        # (heads*tq, dh) f32
        o = None
        for h in range(heads):
            part = jnp.dot(outn[h * tq:(h + 1) * tq].astype(cd),
                           wo_ref[h * dim_head:(h + 1) * dim_head, :],
                           preferred_element_type=jnp.float32)
            o = part if o is None else o + part
        o_ref[0] = o.astype(o_ref.dtype)


def palm_attention(x, gamma, wq, wkv, wo, *, heads, dim_head, eps=1e-5):
    b, n, dim = x.shape
    inner = heads * dim_head
    assert wq.shape == (dim, inner)
    assert wkv.shape == (dim, 2 * dim_head)
    assert wo.shape == (inner, dim)
    scale = dim_head ** -0.5
    half = dim_head // 2

    if n % 256 == 0:
        t = 256
    elif n % 128 == 0:
        t = 128
    else:
        # TODO(synk): pad / mask ragged sequence lengths instead of requiring /128.
        raise ValueError("sequence length must be a multiple of 128")
    assert (t & (t - 1)) == 0

    # Rotary tables (RotaryEmbedding.forward) — small (n, dim_head) constants in plain JAX.
    inv_freq = 1.0 / (10000.0 ** (jnp.arange(0, dim_head, 2, dtype=jnp.float32) / dim_head))
    freqs = jnp.arange(n, dtype=jnp.float32)[:, None] * inv_freq[None, :]
    pos = jnp.concatenate([freqs, freqs], axis=-1)                       # (n, dim_head)
    cos, sin = jnp.cos(pos), jnp.sin(pos)
    sign = jnp.concatenate([-jnp.ones((half,), jnp.float32),
                            jnp.ones((half,), jnp.float32)])
    sin_sgn = sin * sign                   # rotate_half sign folded in
    cos_q = cos * scale                    # query scale folded into the q RoPE tables
    sin_q = sin_sgn * scale

    vmem_limit = _pick_vmem_limit()
    gamma2d = gamma.reshape(1, dim)
    cd = wq.dtype                          # MXU compute dtype (bf16 in the test)

    # ---- prologue: roped K and V for the whole sequence (computed once) ----
    k_all, v_all = pl.pallas_call(
        partial(_kv_proj_kernel, dim_head=dim_head, eps=eps),
        out_shape=(jax.ShapeDtypeStruct((b, n, dim_head), cd),
                   jax.ShapeDtypeStruct((b, n, dim_head), cd)),
        grid_spec=pltpu.PrefetchScalarGridSpec(
            num_scalar_prefetch=0,
            grid=(b, n // t),
            in_specs=[
                pl.BlockSpec((1, t, dim), lambda b_, i: (b_, i, 0)),          # x
                pl.BlockSpec((1, dim), lambda b_, i: (0, 0)),                 # gamma
                pl.BlockSpec((dim, 2 * dim_head), lambda b_, i: (0, 0)),      # W_kv
                pl.BlockSpec((t, dim_head), lambda b_, i: (i, 0)),            # cos
                pl.BlockSpec((t, dim_head), lambda b_, i: (i, 0)),            # sin (signed)
            ],
            out_specs=[
                pl.BlockSpec((1, t, dim_head), lambda b_, i: (b_, i, 0)),     # K (roped)
                pl.BlockSpec((1, t, dim_head), lambda b_, i: (b_, i, 0)),     # V
            ],
        ),
        compiler_params=pltpu.CompilerParams(
            dimension_semantics=("parallel", "parallel"),
            vmem_limit_bytes=vmem_limit,
        ),
    )(x, gamma2d, wkv, cos, sin_sgn)

    # ---- flattened lower-triangular (iq, ik) schedule via scalar prefetch ----
    tq = tk = t
    nq = n // tq
    sched = [(i, j) for i in range(nq) for j in range(((i + 1) * tq - 1) // tk + 1)]
    iq_tab = jnp.asarray([p[0] for p in sched], dtype=jnp.int32)
    ik_tab = jnp.asarray([p[1] for p in sched], dtype=jnp.int32)
    last_tab = jnp.asarray([1 if p[1] == ((p[0] + 1) * tq - 1) // tk else 0 for p in sched],
                           dtype=jnp.int32)
    num_steps = len(sched)

    kernel = partial(_attn_kernel, heads=heads, dim_head=dim_head, eps=eps, tq=tq, tk=tk)
    return pl.pallas_call(
        kernel,
        out_shape=jax.ShapeDtypeStruct((b, n, dim), x.dtype),
        grid_spec=pltpu.PrefetchScalarGridSpec(
            num_scalar_prefetch=3,
            grid=(b, num_steps),
            in_specs=[
                pl.BlockSpec((1, tq, dim), lambda b_, s, iqt, ikt, lt: (b_, iqt[s], 0)),       # x (q tile)
                pl.BlockSpec((1, dim), lambda b_, s, iqt, ikt, lt: (0, 0)),                    # gamma
                pl.BlockSpec((dim, inner), lambda b_, s, iqt, ikt, lt: (0, 0)),                # W_q
                pl.BlockSpec((inner, dim), lambda b_, s, iqt, ikt, lt: (0, 0)),                # W_out
                pl.BlockSpec((tq, dim_head), lambda b_, s, iqt, ikt, lt: (iqt[s], 0)),         # cos (q)
                pl.BlockSpec((tq, dim_head), lambda b_, s, iqt, ikt, lt: (iqt[s], 0)),         # sin (q)
                pl.BlockSpec((1, tk, dim_head), lambda b_, s, iqt, ikt, lt: (b_, ikt[s], 0)),  # K
                pl.BlockSpec((1, tk, dim_head), lambda b_, s, iqt, ikt, lt: (b_, ikt[s], 0)),  # V
            ],
            out_specs=pl.BlockSpec((1, tq, dim), lambda b_, s, iqt, ikt, lt: (b_, iqt[s], 0)),
            scratch_shapes=[
                pltpu.VMEM((heads * tq, dim_head), cd),          # roped+scaled q (flattened heads)
                pltpu.VMEM((heads * tq, 1), jnp.float32),        # m (running max)
                pltpu.VMEM((heads * tq, 1), jnp.float32),        # l (running denominator)
                pltpu.VMEM((heads * tq, dim_head), jnp.float32), # acc (running numerator)
            ],
        ),
        compiler_params=pltpu.CompilerParams(
            dimension_semantics=("parallel", "arbitrary"),
            vmem_limit_bytes=vmem_limit,
        ),
    )(iq_tab, ik_tab, last_tab, x, gamma2d, wq, wo, cos_q, sin_q, k_all, v_all)


def reference(x, gamma, wq, wkv, wo, *, heads, dim_head):
    """Pure-JAX (f32) re-implementation of the PyTorch forward pass for verification."""
    eps = 1e-5
    b, n, dim = x.shape
    mean = x.mean(-1, keepdims=True)
    var = ((x - mean) ** 2).mean(-1, keepdims=True)
    xn = (x - mean) / jnp.sqrt(var + eps) * gamma
    q = xn @ wq
    kv = xn @ wkv
    k, v = kv[..., :dim_head], kv[..., dim_head:]
    q = q.reshape(b, n, heads, dim_head).transpose(0, 2, 1, 3)   # b h n d

    inv_freq = 1.0 / (10000.0 ** (jnp.arange(0, dim_head, 2, dtype=jnp.float32) / dim_head))
    freqs = jnp.arange(n, dtype=jnp.float32)[:, None] * inv_freq[None, :]
    pos = jnp.concatenate([freqs, freqs], -1)

    def rope(t):
        half = dim_head // 2
        t1, t2 = t[..., :half], t[..., half:]
        rot = jnp.concatenate([-t2, t1], -1)
        return t * jnp.cos(pos) + rot * jnp.sin(pos)

    q = rope(q) * dim_head ** -0.5
    k = rope(k)
    sim = jnp.einsum('bhid,bjd->bhij', q, k)
    mask = jnp.tril(jnp.ones((n, n), dtype=bool))
    sim = jnp.where(mask, sim, -1e30)
    attn = jax.nn.softmax(sim, axis=-1)
    out = jnp.einsum('bhij,bjd->bhid', attn, v)
    out = out.transpose(0, 2, 1, 3).reshape(b, n, heads * dim_head)
    return out @ wo


if __name__ == "__main__":
    # Small but lane-dense shapes consistent with Attention(dim, dim_head, heads);
    # seq=512 exercises the multi-tile (masked / unmasked / first / rest) schedule.
    batch, seq, dim = 2, 512, 128
    heads, dim_head = 4, 128
    inner = heads * dim_head

    key = jax.random.PRNGKey(0)
    kx, kq, kkv, ko = jax.random.split(key, 4)

    x = jax.random.normal(kx, (batch, seq, dim), dtype=jnp.float32)
    gamma = jnp.ones((dim,), dtype=jnp.float32)                                    # LayerNorm.gamma init
    wq_f32 = jax.random.normal(kq, (dim, inner), dtype=jnp.float32) * 0.05         # to_q   (in, out)
    wkv_f32 = jax.random.normal(kkv, (dim, 2 * dim_head), dtype=jnp.float32) * 0.05  # to_kv (in, out)
    wo_f32 = jax.random.normal(ko, (inner, dim), dtype=jnp.float32) * 0.05         # to_out (in, out)

    # bf16 weights -> bf16 MXU inputs inside the kernels, f32 accumulation.
    wq = wq_f32.astype(jnp.bfloat16)
    wkv = wkv_f32.astype(jnp.bfloat16)
    wo = wo_f32.astype(jnp.bfloat16)

    out = palm_attention(x, gamma, wq, wkv, wo, heads=heads, dim_head=dim_head)
    out = jax.block_until_ready(out)

    ref = reference(x, gamma, wq.astype(jnp.float32), wkv.astype(jnp.float32),
                    wo.astype(jnp.float32), heads=heads, dim_head=dim_head)
    assert out.shape == (batch, seq, dim)
    err = jnp.max(jnp.abs(out - ref))
    assert jnp.allclose(out, ref, rtol=3e-2, atol=3e-2), f"max abs err {err}"

    print("KERNEL_OK")
</pallas_src>

<mosaic_0001>
module attributes {stable_mosaic.version = 11 : i64} {
  func.func @_kv_proj_kernel(%arg0: i32, %arg1: i32, %arg2: memref<1x256x128xf32, #tpu.memory_space<vmem>>, %arg3: memref<1x128xf32, #tpu.memory_space<vmem>>, %arg4: memref<128x256xbf16, #tpu.memory_space<vmem>>, %arg5: memref<256x128xf32, #tpu.memory_space<vmem>>, %arg6: memref<256x128xf32, #tpu.memory_space<vmem>>, %arg7: memref<1x256x128xbf16, #tpu.memory_space<vmem>>, %arg8: memref<1x256x128xbf16, #tpu.memory_space<vmem>>) attributes {dimension_semantics = [#tpu.dimension_semantics<parallel>, #tpu.dimension_semantics<parallel>], iteration_bounds = array<i64: 2, 2>, scalar_prefetch = 0 : i64, scratch_operands = 0 : i64, tpu.core_type = #tpu.core_type<tc>, window_params = [{transform_indices = @transform_0, window_bounds = array<i64: 1, 256, 128>}, {pipeline_mode = #tpu.pipeline_mode<synchronous>, transform_indices = @transform_1, window_bounds = array<i64: 1, 128>}, {pipeline_mode = #tpu.pipeline_mode<synchronous>, transform_indices = @transform_2, window_bounds = array<i64: 128, 256>}, {transform_indices = @transform_3, window_bounds = array<i64: 256, 128>}, {transform_indices = @transform_4, window_bounds = array<i64: 256, 128>}, {transform_indices = @transform_5, window_bounds = array<i64: 1, 256, 128>}, {transform_indices = @transform_6, window_bounds = array<i64: 1, 256, 128>}]} {
    %c0 = arith.constant 0 : index
    %c0_0 = arith.constant 0 : index
    %c0_1 = arith.constant 0 : index
    %0 = vector.load %arg2[%c0, %c0_0, %c0_1] : memref<1x256x128xf32, #tpu.memory_space<vmem>>, vector<1x256x128xf32>
    %1 = vector.shape_cast %0 : vector<1x256x128xf32> to vector<256x128xf32>
    %cst = arith.constant dense<0.000000e+00> : vector<256xf32>
    %2 = vector.multi_reduction <add>, %1, %cst [1] : vector<256x128xf32> to vector<256xf32>
    %3 = vector.shape_cast %2 : vector<256xf32> to vector<256x1xf32>
    %cst_2 = arith.constant 1.280000e+02 : f32
    %4 = vector.broadcast %cst_2 : f32 to vector<256x1xf32>
    %5 = arith.divf %3, %4 : vector<256x1xf32>
    %6 = vector.broadcast %5 : vector<256x1xf32> to vector<256x128xf32>
    %7 = arith.subf %1, %6 : vector<256x128xf32>
    %8 = arith.mulf %7, %7 : vector<256x128xf32>
    %cst_3 = arith.constant dense<0.000000e+00> : vector<256xf32>
    %9 = vector.multi_reduction <add>, %8, %cst_3 [1] : vector<256x128xf32> to vector<256xf32>
    %10 = vector.shape_cast %9 : vector<256xf32> to vector<256x1xf32>
    %cst_4 = arith.constant 1.280000e+02 : f32
    %11 = vector.broadcast %cst_4 : f32 to vector<256x1xf32>
    %12 = arith.divf %10, %11 : vector<256x1xf32>
    %13 = vector.broadcast %5 : vector<256x1xf32> to vector<256x128xf32>
    %14 = arith.subf %1, %13 : vector<256x128xf32>
    %cst_5 = arith.constant 9.99999974E-6 : f32
    %15 = vector.broadcast %cst_5 : f32 to vector<256x1xf32>
    %16 = arith.addf %12, %15 : vector<256x1xf32>
    %17 = math.rsqrt %16 : vector<256x1xf32>
    %18 = vector.broadcast %17 : vector<256x1xf32> to vector<256x128xf32>
    %19 = arith.mulf %14, %18 : vector<256x128xf32>
    %c0_6 = arith.constant 0 : index
    %c0_7 = arith.constant 0 : index
    %20 = vector.load %arg3[%c0_6, %c0_7] : memref<1x128xf32, #tpu.memory_space<vmem>>, vector<1x128xf32>
    %21 = vector.broadcast %20 : vector<1x128xf32> to vector<256x128xf32>
    %22 = arith.mulf %19, %21 : vector<256x128xf32>
    %23 = arith.truncf %22 : vector<256x128xf32> to vector<256x128xbf16>
    %c0_8 = arith.constant 0 : index
    %c0_9 = arith.constant 0 : index
    %24 = vector.load %arg4[%c0_8, %c0_9] : memref<128x256xbf16, #tpu.memory_space<vmem>>, vector<128x256xbf16>
    %cst_10 = arith.constant dense<0.000000e+00> : vector<256x256xf32>
    %25 = tpu.matmul %23, %24, %cst_10 {dimension_numbers = #tpu.dot_dimension_numbers<[1], [0], [0], [1], [0, 0, 1, 1], [], []>} : vector<256x128xbf16>, vector<128x256xbf16>, vector<256x256xf32> -> vector<256x256xf32>
    %26 = vector.extract_strided_slice %25 {offsets = [0, 0], sizes = [256, 128], strides = [1, 1]} : vector<256x256xf32> to vector<256x128xf32>
    %27 = vector.extract_strided_slice %25 {offsets = [0, 128], sizes = [256, 128], strides = [1, 1]} : vector<256x256xf32> to vector<256x128xf32>
    %c0_11 = arith.constant 0 : index
    %c0_12 = arith.constant 0 : index
    %28 = vector.load %arg5[%c0_11, %c0_12] : memref<256x128xf32, #tpu.memory_space<vmem>>, vector<256x128xf32>
    %29 = arith.mulf %26, %28 : vector<256x128xf32>
    %c64_i32 = arith.constant 64 : i32
    %30 = tpu.dynamic_rotate %26 by %c64_i32 dim 1 : vector<256x128xf32>, i32 -> vector<256x128xf32>
    %c0_13 = arith.constant 0 : index
    %c0_14 = arith.constant 0 : index
    %31 = vector.load %arg6[%c0_13, %c0_14] : memref<256x128xf32, #tpu.memory_space<vmem>>, vector<256x128xf32>
    %32 = arith.mulf %30, %31 : vector<256x128xf32>
    %33 = arith.addf %29, %32 : vector<256x128xf32>
    %34 = arith.truncf %33 : vector<256x128xf32> to vector<256x128xbf16>
    %c0_15 = arith.constant 0 : index
    %c0_16 = arith.constant 0 : index
    %c0_17 = arith.constant 0 : index
    %35 = vector.load %arg7[%c0_15, %c0_16, %c0_17] : memref<1x256x128xbf16, #tpu.memory_space<vmem>>, vector<1x256x128xbf16>
    %36 = vector.shape_cast %35 : vector<1x256x128xbf16> to vector<256x128xbf16>
    %37 = vector.shape_cast %34 : vector<256x128xbf16> to vector<1x256x128xbf16>
    tpu.vector_store %arg7[%c0_15, %c0_16, %c0_17], %37 {strides = array<i32>} : memref<1x256x128xbf16, #tpu.memory_space<vmem>>, vector<1x256x128xbf16>,
    %38 = arith.truncf %27 : vector<256x128xf32> to vector<256x128xbf16>
    %c0_18 = arith.constant 0 : index
    %c0_19 = arith.constant 0 : index
    %c0_20 = arith.constant 0 : index
    %39 = vector.load %arg8[%c0_18, %c0_19, %c0_20] : memref<1x256x128xbf16, #tpu.memory_space<vmem>>, vector<1x256x128xbf16>
    %40 = vector.shape_cast %39 : vector<1x256x128xbf16> to vector<256x128xbf16>
    %41 = vector.shape_cast %38 : vector<256x128xbf16> to vector<1x256x128xbf16>
    tpu.vector_store %arg8[%c0_18, %c0_19, %c0_20], %41 {strides = array<i32>} : memref<1x256x128xbf16, #tpu.memory_space<vmem>>, vector<1x256x128xbf16>,
    return
  }
  func.func @transform_0(%arg0: i32, %arg1: i32) -> (i32, i32, i32) {
    %c0_i32 = arith.constant 0 : i32
    %c0_i32_0 = arith.constant 0 : i32
    return %arg0, %arg1, %c0_i32 : i32, i32, i32
  }
  func.func @transform_1(%arg0: i32, %arg1: i32) -> (i32, i32) {
    %c0_i32 = arith.constant 0 : i32
    %c0_i32_0 = arith.constant 0 : i32
    %c0_i32_1 = arith.constant 0 : i32
    return %c0_i32, %c0_i32_0 : i32, i32
  }
  func.func @transform_2(%arg0: i32, %arg1: i32) -> (i32, i32) {
    %c0_i32 = arith.constant 0 : i32
    %c0_i32_0 = arith.constant 0 : i32
    %c0_i32_1 = arith.constant 0 : i32
    return %c0_i32, %c0_i32_0 : i32, i32
  }
  func.func @transform_3(%arg0: i32, %arg1: i32) -> (i32, i32) {
    %c0_i32 = arith.constant 0 : i32
    %c0_i32_0 = arith.constant 0 : i32
    return %arg1, %c0_i32 : i32, i32
  }
  func.func @transform_4(%arg0: i32, %arg1: i32) -> (i32, i32) {
    %c0_i32 = arith.constant 0 : i32
    %c0_i32_0 = arith.constant 0 : i32
    return %arg1, %c0_i32 : i32, i32
  }
  func.func @transform_5(%arg0: i32, %arg1: i32) -> (i32, i32, i32) {
    %c0_i32 = arith.constant 0 : i32
    %c0_i32_0 = arith.constant 0 : i32
    return %arg0, %arg1, %c0_i32 : i32, i32, i32
  }
  func.func @transform_6(%arg0: i32, %arg1: i32) -> (i32, i32, i32) {
    %c0_i32 = arith.constant 0 : i32
    %c0_i32_0 = arith.constant 0 : i32
    return %arg0, %arg1, %c0_i32 : i32, i32, i32
  }
}

</mosaic_0001>

<bundles_post_ra>
// kernel: tpu_custom_call.1
= control target key start
LH: loop header
LB: loop body
LE: loop exit
PB: predicated region body
PF: predicated region fallthrough
CT: control target
= control target key end

     0   :  { %s4246_s0 = inlined_call_operand.hbm [shape: f32[2,512,128], index: 0, kind: input, shape index: {}]   ;;  %s4247_s1 = inlined_call_operand.hbm [shape: f32[1,128], index: 1, kind: input, shape index: {}]   ;;  %s4248_s2 = inlined_call_operand.hbm [shape: bf16[128,256], index: 2, kind: input, shape index: {}]   ;;  %s4249_s3 = inlined_call_operand.hbm [shape: f32[512,128], index: 3, kind: input, shape index: {}]   ;;  %s4250_s4 = inlined_call_operand.hbm [shape: f32[512,128], index: 4, kind: input, shape index: {}]   ;;  %s4251_s5 = inlined_call_operand.hbm [shape: bf16[2,512,128], index: 5, kind: output, shape index: {0}]   ;;  %s4252_s6 = inlined_call_operand.hbm [shape: bf16[2,512,128], index: 6, kind: output, shape index: {1}]  }
   0x1   :  { %4271 = sst [smem:[#allocation30_spill]] %s4247_s1 }
   0x2   :  { %4272 = sst [smem:[#allocation31_spill]] %s4248_s2 }
   0x3   :  { %4273 = sst [smem:[#allocation32_spill]] %s4249_s3 }
   0x4   :  { %4274 = sst [smem:[#allocation33_spill]] %s4250_s4 }
   0x5   :  { %4275 = sst [smem:[#allocation34_spill]] %s4251_s5 }
   0x6   :  { %4276 = sst [smem:[#allocation35_spill]] %s4252_s6 }
   0x7   :  { %12 = vsyncpa [#allocation3], 0 }
   0x8   :  { %14 = vsyncpa [#allocation3 + $0x1], 0 }
   0x9   :  { %15 = vsyncpa [#allocation6], 0 }
   0xa   :  { %16 = vsyncpa [#allocation9], 0 }
   0xb   :  { %18 = vsyncpa [#allocation9 + $0x1], 0 }
   0xc   :  { %19 = vsyncpa [#allocation4], 0 }
   0xd   :  { %21 = vsyncpa [#allocation4 + $0x1], 0 }
   0xe   :  { %22 = vsyncpa [#allocation13], 0 }
   0xf   :  { %24 = vsyncpa [#allocation13 + $0x1], 0  ;;  %s2896_s21 = smov 0   ;;  %s2898_s22 = smov 0  }
  0x10   :  { %s2900_s23 = smov 0   ;;  %s2902_s24 = smov 0  }
  0x11   :  { %s2904_s25 = smov 0   ;;  %s2906_s26 = smov 0  }
  0x12   :  { %s2908_s27 = smov 0   ;;  %s2910_s28 = smov 0  }
  0x13   :  { %s2912_s29 = smov 0   ;;  %s2914_s30 = smov 0  }
  0x14   :  { %s2916_s7 = smov 0  }
  0x15 LB: > { %4277 = sst [smem:[#allocation19_spill]] %s2816_s22  ;;  %s2950_s8 = sadd.s32 4294967295, %s2852_s7   ;;  %s2852_s7 = sphi %s2916_s7, %s30_s7   ;;  %s2848_s30 = sphi %s2914_s30, %s4355_s30   ;;  %s2844_s29 = sphi %s2912_s29, %s4354_s29   ;;  %s2840_s28 = sphi %s2910_s28, %s4353_s28   ;;  %s2836_s27 = sphi %s2908_s27, %s4352_s27   ;;  %s2832_s26 = sphi %s2906_s26, %s4351_s26   ;;  %s2828_s25 = sphi %s2904_s25, %s4350_s25   ;;  %s2824_s24 = sphi %s2902_s24, %s4349_s24   ;;  %s2820_s23 = sphi %s2900_s23, %s4347_s23   ;;  %s2816_s22 = sphi %s2898_s22, %s4346_s22   ;;  %s2812_s21 = sphi %s2896_s21, %s4345_s21  }
  0x16   : > { %4278 = sst [smem:[#allocation20_spill]] %s2820_s23  ;;  %s2008_s9 = sadd.s32 4294967294, %s2852_s7  }
  0x17   : > { %4279 = sst [smem:[#allocation21_spill]] %s2824_s24  ;;  %p64_p0 = scmp.ne.s32.totalorder %s2828_s25, %s2824_s24 }
  0x18   : > { %4280 = sst [smem:[#allocation22_spill]] %s2836_s27  ;;  %p4260_p1 = scmp.eq.s32.totalorder %s2950_s8, 0 }
  0x19   : > { %4281 = sst [smem:[#allocation23_spill]] %s2840_s28  ;;  %p132_p2 = scmp.ne.s32.totalorder %s2816_s22, %s2812_s21 }
  0x1a   : > { %4282 = sst [smem:[#allocation24_spill]] %s2950_s8  ;;  %p2959_p3 = por %p4260_p1, %p64_p0 }
  0x1b   : > { %p190_p4 = scmp.eq.s32.totalorder %s2008_s9, 3  ;;  %p2965_p5 = por %p132_p2, %p4260_p1 }
  0x1c   : > { %p2009_p6 = scmp.ge.s32.totalorder %s2852_s7, 1  ;;  %p225_p8 = scmp.lt.s32.totalorder %s2852_s7, 5 }
  0x1d   : > { %s4284_s11 = scalar_select %p2965_p5, 1, 0 }
  0x1e   : > { %p2970_p7 = por %p190_p4, %p64_p0  ;;  %s4288_s1 = sld [smem:[#allocation30_spill]] }
  0x1f   : > { %4285 = sst [smem:[#allocation25_spill]] %s4284_s11  ;;  %p2978_p9 = pnand %p2009_p6, %p225_p8 }
  0x20   : > { %s4286_s12 = scalar_select %p2970_p7, 1, 0 }
  0x21   : > { %p2347_p10 = pneg %p2978_p9  ;;  %s2854_s17 = smov [#allocation5]  }
  0x22   : > { %4287 = sst [smem:[#allocation26_spill]] %s4286_s12  ;;  %s239_s18 = sshll.u32 %s2854_s17, 4  ;;  %s240_s18 = int_to_ptr.vmem [resolvable:$true] %s239_s18 }
  0x23   : > { %p2986_p11 = pnand %p2347_p10, %p4260_p1  ;;  %s39_s20 = sadd.s32 1, %s2844_s29 }
  0x24   : > { %s237_s15 = sshll.u32 %s4288_s1, 4  ;;  %p2993_p12 = scmp.ge.s32.totalorder %s39_s20, 2  ;;  %s238_s15 = int_to_ptr.hbm [resolvable:$true] %s237_s15 }
  0x25   : > { %2350 = dma.hbm_to_vmem [thread:$0]  (!%p2986_p11), %s238_s15, 16, %s240_s18, [#allocation6]  }
  0x26   : > { %p59_p13 = scmp.eq.s32.totalorder %s2852_s7, 0  ;;  %s119_s9 = sadd.s32 1, %s2820_s23 }
  0x27   : > { %p126_p0 = scmp.ne.s32.totalorder %s2820_s23, %s2816_s22  ;;  %s4357_s20 = smov (%p2993_p12, %s39_s20), 0 }
  0x28   : > { %4292 = sst [smem:[#allocation27_spill]] %s4357_s20  ;;  %s3013_s14 = ssub.s32 %s2844_s29, %s4357_s20 }
  0x29   : > { %p3007_p2 = por %p126_p0, %p59_p13  ;;  %p117_p4 = scmp.eq.s32.totalorder %s3013_s14, 0 }
  0x2a   : > { %p2373_p6 = scmp.lt.s32.totalorder %s2852_s7, 4  ;;  %s288_s15 = sand.u32 1, %s2852_s7  }
  0x2b   : > { %s290_s17 = sand.u32 1, %s2820_s23   ;;  %s2105_s12 = sshll.u32 %s2844_s29, 8 }
  0x2c   : > { %s3020_s18 = scalar_select %p117_p4, %s2820_s23, %s119_s9  }
  0x2d   : > { %s2017_s1 = sshll.u32 %s290_s17, 8  ;;  %s4295_s3 = sld [smem:[#allocation32_spill]] }
  0x2e   : > { %4294 = sst [smem:[#allocation28_spill]] %s3020_s18  ;;  %s292_s28 = scalar_lea.vmem [#allocation8], %s2017_s1 }
  0x2f   : > { %s300_s27 = sshll.u32 %s292_s28, 4  ;;  %p3030_p8 = pnand %p2373_p6, %p3007_p2  ;;  %s301_s27 = int_to_ptr.vmem [resolvable:$true] %s300_s27 }
  0x30   : > { %s4297_s4 = sld [smem:[#allocation33_spill]]  ;;  %s3037_s24 = scalar_lea.sflag [#allocation9], %s288_s15 }
  0x31   : > { %s4263_s28 = smov 8   ;;  %p184_p10 = scmp.eq.s32.totalorder %s2950_s8, 3 }
  0x32   : > { %s4298_s2 = sld [smem:[#allocation31_spill]]  ;;  %p58_p0 = scmp.ne.s32.totalorder %s2832_s26, %s2828_s25 }
  0x33   : > { %s297_s6 = scalar_lea.hbm %s4295_s3, %s2105_s12  ;;  %s2014_s21 = sshll.u32 %s2844_s29, 5 }
  0x34   : > { %s298_s11 = sshll.u32 %s297_s6, 4  ;;  %s4261_s6 = smov 128   ;;  %s299_s11 = int_to_ptr.hbm [resolvable:$true] %s298_s11 }
  0x35   : > { %2360 = dma.hbm_to_vmem [thread:$0]  (!%p3030_p8), %s299_s11, 4096, %s301_s27, %s3037_s24, %s4261_s6, %s4261_s6, %s4263_s28  }
  0x36   : > { %s319_s17 = scalar_lea.hbm %s4297_s4, %s2105_s12  ;;  %s314_s12 = scalar_lea.vmem [#allocation10], %s2017_s1 }
  0x37   : > { %s320_s5 = sshll.u32 %s319_s17, 4  ;;  %s3048_s13 = sshll.u32 %s314_s12, 4  ;;  %s3046_s5 = int_to_ptr.hbm [resolvable:$true] %s320_s5  ;;  %s323_s13 = int_to_ptr.vmem [resolvable:$true] %s3048_s13 }
  0x38   : > { %s248_s9 = sshll.u32 %s4298_s2, 4  ;;  %s2857_s17 = smov [#allocation7]   ;;  %s249_s9 = int_to_ptr.hbm [resolvable:$true] %s248_s9 }
  0x39   : > { %s250_s3 = sshll.u32 %s2857_s17, 4  ;;  %s42_s1 = sadd.s32 1, %s2848_s30  ;;  %s251_s3 = int_to_ptr.vmem [resolvable:$true] %s250_s3 }
  0x3a   : > { %2353 = dma.hbm_to_vmem [thread:$0]  (!%p2986_p11), %s249_s9, 2048, %s251_s3, [#allocation6], %s4261_s6, %s4261_s6, %s4263_s28  }
  0x3b   : > { %s51_s27 = sadd.s32 1, %s2832_s26  ;;  %s4359_s1 = smov (!%p2993_p12, %s42_s1), %s2848_s30 }
  0x3c   : > { %s264_s11 = sand.u32 1, %s2832_s26   ;;  %p44_p2 = scmp.ge.s32.totalorder %s4359_s1, 2 }
  0x3d   : > { %p3068_p4 = por %p59_p13, %p58_p0  ;;  %p3074_p1 = por %p184_p10, %p58_p0 }
  0x3e   : > { %s4361_s1 = smov (%p44_p2, %s4359_s1), 0  ;;  %s2013_s3 = sshll.u32 %s264_s11, 8 }
  0x3f   : > { %s4300_s19 = scalar_select %p3074_p1, 1, 0 }
  0x40   : > { %s46_s15 = ssub.s32 %s2848_s30, %s4361_s1  ;;  %s2015_s9 = sshll.u32 %s2848_s30, 6 }
  0x41   : > { %4301 = sst [smem:[#allocation29_spill]] %s4300_s19  ;;  %s48_s18 = sor.u32 %s3013_s14, %s46_s15 }
  0x42   : > { %p49_p11 = scmp.eq.s32.totalorder %s48_s18, 0  ;;  %s273_s17 = sadd.s32 %s2015_s9, %s2014_s21 }
  0x43   : > { %s2016_s6 = sshll.u32 %s273_s17, 3  ;;  %s268_s28 = scalar_lea.vmem [#allocation2], %s2013_s3 }
  0x44   : > { %s278_s2 = sshll.u32 %s268_s28, 4  ;;  %s275_s22 = scalar_lea.hbm %s4246_s0, %s2016_s6  ;;  %s279_s2 = int_to_ptr.vmem [resolvable:$true] %s278_s2 }
  0x45   : > { %s3086_s4 = scalar_select %p49_p11, %s2832_s26, %s51_s27  }
  0x46   : > { %s276_s8 = sshll.u32 %s275_s22, 4  ;;  %p2355_p12 = pnand %p2373_p6, %p3068_p4  ;;  %s277_s8 = int_to_ptr.hbm [resolvable:$true] %s276_s8 }
  0x47   : > { %s265_s14 = scalar_lea.sflag [#allocation3], %s264_s11  ;;  %s4302_s15 = smov 8  }
  0x48   : > { %s4303_s18 = smov 128   ;;  %334 = sbr.rel (%p2978_p9) target bundleno = 827 (0x33b), region = 40 }
  0x49   : > { %2357 = dma.hbm_to_vmem [thread:$0]  (!%p2355_p12), %s277_s8, 4096, %s279_s2, %s265_s14, %s4303_s18, %s4303_s18, %s4302_s15  }
  0x4a   : > { %2363 = dma.hbm_to_vmem [thread:$0]  (!%p3030_p8), %s3046_s5, 4096, %s323_s13, %s3037_s24, %s4303_s18, %s4303_s18, %s4302_s15  }
  0x4b   : > { %s3109_s22 = sand.u32 (!%p2978_p9), 1, %s2828_s25  }
  0x4c   : > { %s2024_s23 = sshll.u32 (!%p2978_p9), %s3109_s22, 8  ;;  %s337_s6 = scalar_lea.sflag (!%p2978_p9), [#allocation3], %s3109_s22 }
  0x4d   : > { %s3113_s28 = scalar_lea.vmem [#allocation2], %s2024_s23 }
  0x4e   : > { %2791 = dma.done.wait (%p2959_p3), %s337_s6, 4096  }
  0x4f   : > { %2793 = vsyncadd (%p2959_p3), %s337_s6, 4294963200  ;;  %s4304_s2 = sld [smem:[#allocation24_spill]] }
  0x55   : > { %p4305_p13 = scmp.eq.s32.totalorder %s4304_s2, 0 }
  0x57   : > { %2795 = dma.done.wait (%p4305_p13), [#allocation6], 2064   ;;  %p4306_p9 = pmov %p4305_p13 }
  0x58   : > { %s4307_s8 = sld [smem:[#allocation19_spill]]  ;;  %s356_s20 = sand.u32 1, %s4304_s2  }
  0x59   : > { %2797 = vsyncadd (%p4306_p9), [#allocation6], 4294965232  ;;  %s357_s13 = scalar_lea.sflag [#allocation9], %s356_s20 }
  0x5e   : > { %s358_s5 = sand.u32 1, %s4307_s8  }
  0x5f   : > { %s3125_s24 = sshll.u32 %s358_s5, 8 }
  0x60   : > { %s3128_s27 = scalar_lea.vmem [#allocation8], %s3125_s24 }
  0x61   : > { %2799 = dma.done.wait (%p2965_p5), %s357_s13, 8192  }
  0x62   : > { %2801 = vsyncadd (%p2965_p5), %s357_s13, 4294959104  ;;  %v3135_v0 = vld [vmem:[%s3113_s28 + $0x90] sm:$0xff]  ;;  %v436_v1 = vld [vmem:[%s3113_s28 + $0x80] sm:$0xff]  ;;  %v2858_v22 = vmov 128.0   ;;  %s2859_s10 = smov 64   ;;  %s2029_s11 = sshll.u32 %s3109_s22, 7 }
  0x63   : > { %v3139_v2 = vld [vmem:[%s3113_s28] sm:$0xff]  ;;  %488 = vadd.xlane.f32.xlu2 %v3135_v0  ;;  %484 = vadd.xlane.f32.xlu0 %v436_v1  ;;  %v439_v3 = vld [vmem:[%s3113_s28 + $0x98] sm:$0xff]  ;;  %v437_v4 = vld [vmem:[%s3113_s28 + $0x88] sm:$0xff]  ;;  %2473 = vrcp.f32 %v2858_v22  ;;  %s3840_s12 = scalar_lea.vmem [#allocation12], %s2029_s11  ;;  %s4001_s19 = scalar_lea.vmem [#allocation10], %s3125_s24 }
  0x64   : > { %452 = vadd.xlane.f32.xlu1 %v3139_v2  ;;  %v421_v5 = vld [vmem:[%s3113_s28 + $0x8] sm:$0xff]  ;;  %v3147_v6 = vld [vmem:[%s3113_s28 + $0x10] sm:$0xff]  ;;  %v3150_v7 = vld [vmem:[%s3113_s28 + $0xa0] sm:$0xff]  ;;  %s4015_s3 = scalar_lea.vmem [#allocation11], %s2029_s11  ;;  %s4337_s21 = sld [smem:[#allocation22_spill]] }
  0x65   : > { %v3153_v8 = vld [vmem:[%s3113_s28 + $0x18] sm:$0xff]  ;;  %v3159_v9 = vld [vmem:[%s3113_s28 + $0x28] sm:$0xff]  ;;  %v3165_v11 = vld [vmem:[%s3113_s28 + $0x20] sm:$0xff]  ;;  %s4338_s9 = sld [smem:[#allocation23_spill]]  ;;  %s1816_s16 = sshll.u32 %s3840_s12, 4  ;;  %s1817_s16 = int_to_ptr.vmem [resolvable:$true] %s1816_s16 }
  0x66   : > { %v3162_v10 = vld [vmem:[%s3113_s28 + $0xa8] sm:$0xff]  ;;  %v3171_v12 = vld [vmem:[%s3113_s28 + $0xb0] sm:$0xff]  ;;  %v3174_v13 = vld [vmem:[%s3113_s28 + $0xb8] sm:$0xff]  ;;  %s1783_s24 = scalar_lea.sflag [#allocation13], %s3109_s22 }
  0x67   : > { %v3177_v14 = vld [vmem:[%s3113_s28 + $0x38] sm:$0xff]  ;;  %v3183_v15 = vld [vmem:[%s3113_s28 + $0xc8] sm:$0xff]  ;;  %v3186_v16 = vld [vmem:[%s3113_s28 + $0x30] sm:$0xff] }
  0x68   : > { %v3189_v17 = vld [vmem:[%s3113_s28 + $0xc0] sm:$0xff]  ;;  %v3198_v19 = vld [vmem:[%s3113_s28 + $0x48] sm:$0xff]  ;;  %v3201_v20 = vld [vmem:[%s3113_s28 + $0xd8] sm:$0xff] }
  0x69   : > { %v3195_v18 = vld [vmem:[%s3113_s28 + $0x40] sm:$0xff]  ;;  %v3207_v21 = vld [vmem:[%s3113_s28 + $0xd0] sm:$0xff]  ;;  %v2474_v23 = vpop.eup %2473  ;;  %v3245_v55 = vld [vmem:[%s3113_s28 + $0x58] sm:$0xff] }
  0x6a   : > { %v517_v24 = vmul.f32 128.0, %v2474_v23  ;;  %vm521_vm0 = vweird.f32 %v2474_v23  ;;  %v3255_v63 = vld [vmem:[%s3113_s28 + $0xe8] sm:$0xff]  ;;  %s2097_s17 = sshll.u32 %s4337_s21, 5 }
  0x6b   : > { %490 = vadd.xlane.f32.xlu2 %v439_v3  ;;  %486 = vadd.xlane.f32.xlu0 %v437_v4  ;;  %s2098_s14 = sshll.u32 %s4338_s9, 6 }
  0x6c   : > { %454 = vadd.xlane.f32.xlu1 %v421_v5  ;;  %v518_v25 = vsub.f32 1.0, %v517_v24  ;;  %s4109_s15 = sadd.s32 %s2098_s14, %s2097_s17 }
  0x6d   : > { %s2099_s18 = sshll.u32 %s4109_s15, 2 }
  0x6e   : > { %v519_v26 = vmul.f32 %v2474_v23, %v518_v25 }
  0x70   : > { %v520_v27 = vadd.f32 %v2474_v23, %v519_v26 }
  0x72   : > { %v3210_v28 = vsel %vm521_vm0, %v2474_v23, %v520_v27 }
  0x73   : > { %456 = vadd.xlane.f32.xlu0 %v3147_v6  ;;  %492 = vadd.xlane.f32.xlu2 %v3150_v7 }
  0x74   : > { %458 = vadd.xlane.f32.xlu1 %v3153_v8 }
  0x7b   : > { %462 = vadd.xlane.f32.xlu2 %v3159_v9  ;;  %494 = vadd.xlane.f32.xlu0 %v3162_v10 }
  0x7c   : > { %460 = vadd.xlane.f32.xlu1 %v3165_v11 }
  0x83   : > { %496 = vadd.xlane.f32.xlu2 %v3171_v12  ;;  %498 = vadd.xlane.f32.xlu0 %v3174_v13 }
  0x84   : > { %466 = vadd.xlane.f32.xlu1 %v3177_v14 }
  0x8b   : > { %502 = vadd.xlane.f32.xlu2 %v3183_v15  ;;  %464 = vadd.xlane.f32.xlu0 %v3186_v16 }
  0x8c   : > { %500 = vadd.xlane.f32.xlu1 %v3189_v17 }
  0x93   : > { %468 = vadd.xlane.f32.xlu2 %v3195_v18  ;;  %470 = vadd.xlane.f32.xlu0 %v3198_v19 }
  0x94   : > { %506 = vadd.xlane.f32.xlu1 %v3201_v20 }
  0x9b   : > { %504 = vadd.xlane.f32.xlu0 %v3207_v21 }
  0xd6   : > { %v489_v29 = vpop.xlane.xlu2 %488  ;;  %v485_v30 = vpop.xlane.xlu0 %484 }
  0xd7   : > { %v539_v31 = vmul.f32 %v3210_v28, %v485_v30  ;;  %v453_v32 = vpop.xlane.xlu1 %452  ;;  %v541_v56 = vmul.f32 %v3210_v28, %v489_v29  ;;  %v3290_v29 = vld [vmem:[%s3113_s28 + $0x60] sm:$0xff] }
  0xd8   : > { %v523_v44 = vmul.f32 %v3210_v28, %v453_v32 }
  0xd9   : > { %v3213_v33 = vsub.f32 %v436_v1, %v539_v31  ;;  %v3250_v60 = vsub.f32 %v3135_v0, %v541_v56  ;;  %v3258_v1 = vld [vmem:[%s3113_s28 + $0x50] sm:$0xff] }
  0xda   : > { %v3234_v50 = vsub.f32 %v3139_v2, %v523_v44 }
  0xdb   : > { %v603_v34 = vmul.f32 %v3213_v33, %v3213_v33 }
  0xdc   : > { %v587_v54 = vmul.f32 %v3234_v50, %v3234_v50 }
  0xdd   : > { %651 = vadd.xlane.f32.xlu0 %v603_v34 }
  0xde   : > { %v491_v35 = vpop.xlane.xlu2 %490  ;;  %v487_v36 = vpop.xlane.xlu0 %486 }
  0xdf   : > { %v542_v37 = vmul.f32 %v3210_v28, %v491_v35  ;;  %v540_v38 = vmul.f32 %v3210_v28, %v487_v36  ;;  %v455_v39 = vpop.xlane.xlu1 %454 }
  0xe0   : > { %v524_v40 = vmul.f32 %v3210_v28, %v455_v39 }
  0xe1   : > { %v3220_v41 = vsub.f32 %v439_v3, %v542_v37  ;;  %v3222_v42 = vsub.f32 %v437_v4, %v540_v38  ;;  %v605_v3 = vmul.f32 %v3250_v60, %v3250_v60  ;;  %v3305_v38 = vld [vmem:[%s3113_s28 + $0x68] sm:$0xff] }
  0xe2   : > { %v3224_v43 = vsub.f32 %v421_v5, %v524_v40  ;;  %v3309_v40 = vld [vmem:[%s3113_s28 + $0xe0] sm:$0xff] }
  0xe3   : > { %v606_v45 = vmul.f32 %v3220_v41, %v3220_v41  ;;  %v604_v46 = vmul.f32 %v3222_v42, %v3222_v42 }
  0xe4   : > { %v588_v47 = vmul.f32 %v3224_v43, %v3224_v43 }
  0xe5   : > { %657 = vadd.xlane.f32.xlu0 %v606_v45  ;;  %653 = vadd.xlane.f32.xlu1 %v604_v46 }
  0xe6   : > { %621 = vadd.xlane.f32.xlu2 %v588_v47  ;;  %v457_v48 = vpop.xlane.xlu0 %456  ;;  %v493_v49 = vpop.xlane.xlu2 %492 }
  0xe7   : > { %v525_v51 = vmul.f32 %v3210_v28, %v457_v48  ;;  %v459_v57 = vpop.xlane.xlu1 %458 }
  0xe8   : > { %v526_v62 = vmul.f32 %v3210_v28, %v459_v57 }
  0xe9   : > { %v3238_v52 = vsub.f32 %v3147_v6, %v525_v51 }
  0xea   : > { %v3269_v4 = vsub.f32 %v3153_v8, %v526_v62  ;;  %v543_v8 = vmul.f32 %v3210_v28, %v493_v49  ;;  %v3350_v62 = vld [vmem:[%s3113_s28 + $0xf0] sm:$0xff] }
  0xeb   : > { %v589_v53 = vmul.f32 %v3238_v52, %v3238_v52 }
  0xec   : > { %v590_v23 = vmul.f32 %v3269_v4, %v3269_v4  ;;  %v3286_v26 = vsub.f32 %v3150_v7, %v543_v8 }
  0xed   : > { %623 = vadd.xlane.f32.xlu0 %v589_v53  ;;  %619 = vadd.xlane.f32.xlu1 %v587_v54 }
  0xee   : > { %474 = vadd.xlane.f32.xlu2 %v3245_v55  ;;  %v463_v58 = vpop.xlane.xlu2 %462  ;;  %v495_v59 = vpop.xlane.xlu0 %494  ;;  %v607_v31 = vmul.f32 %v3286_v26, %v3286_v26 }
  0xef   : > { %v528_v61 = vmul.f32 %v3210_v28, %v463_v58  ;;  %v544_v2 = vmul.f32 %v3210_v28, %v495_v59  ;;  %v461_v6 = vpop.xlane.xlu1 %460  ;;  %v3342_v59 = vld [vmem:[%s3113_s28 + $0xf8] sm:$0xff] }
  0xf1   : > { %v3266_v0 = vsub.f32 %v3159_v9, %v528_v61  ;;  %v3272_v5 = vsub.f32 %v3162_v10, %v544_v2  ;;  %v527_v9 = vmul.f32 %v3210_v28, %v461_v6 }
  0xf3   : > { %v592_v22 = vmul.f32 %v3266_v0, %v3266_v0  ;;  %v608_v24 = vmul.f32 %v3272_v5, %v3272_v5  ;;  %v3283_v10 = vsub.f32 %v3165_v11, %v527_v9 }
  0xf5   : > { %510 = vadd.xlane.f32.xlu0 %v3255_v63  ;;  %472 = vadd.xlane.f32.xlu1 %v3258_v1  ;;  %v591_v30 = vmul.f32 %v3283_v10, %v3283_v10 }
  0xf6   : > { %655 = vadd.xlane.f32.xlu2 %v605_v3  ;;  %v497_v25 = vpop.xlane.xlu2 %496  ;;  %v499_v34 = vpop.xlane.xlu0 %498  ;;  %v3355_v3 = vld [vmem:[%s3113_s28 + $0x78] sm:$0xff] }
  0xf7   : > { %v545_v27 = vmul.f32 %v3210_v28, %v497_v25  ;;  %v467_v7 = vpop.xlane.xlu1 %466  ;;  %v546_v37 = vmul.f32 %v3210_v28, %v499_v34  ;;  %v3367_v25 = vld [vmem:[%s3113_s28 + $0x70] sm:$0xff]  ;;  %s4339_s28 = sld [smem:[#allocation35_spill]] }
  0xf8   : > { %v530_v39 = vmul.f32 %v3210_v28, %v467_v7  ;;  %v2121_v34 = vld [vmem:[#allocation7 + $0x74] sm:$0xf] }
  0xf9   : > { %v3298_v11 = vsub.f32 %v3171_v12, %v545_v27  ;;  %v3316_v44 = vsub.f32 %v3174_v13, %v546_v37  ;;  %v2119_v37 = vld [vmem:[#allocation7 + $0x64] sm:$0xf] }
  0xfa   : > { %v3320_v45 = vsub.f32 %v3177_v14, %v530_v39 }
  0xfb   : > { %v609_v35 = vmul.f32 %v3298_v11, %v3298_v11  ;;  %v610_v49 = vmul.f32 %v3316_v44, %v3316_v44 }
  0xfc   : > { %v594_v13 = vmul.f32 %v3320_v45, %v3320_v45 }
  0xfd   : > { %629 = vadd.xlane.f32.xlu0 %v592_v22  ;;  %625 = vadd.xlane.f32.xlu1 %v590_v23  ;;  %s4340_s2 = smov %s4339_s28  ;;  %s1815_s8 = scalar_lea.hbm %s4339_s28, %s2099_s18 }
  0xfe   : > { %661 = vadd.xlane.f32.xlu2 %v608_v24  ;;  %v503_v32 = vpop.xlane.xlu2 %502  ;;  %v465_v47 = vpop.xlane.xlu0 %464  ;;  %s1818_s5 = sshll.u32 %s1815_s8, 4  ;;  %s2710_s17 = scalar_lea.hbm %s4340_s2, 512  ;;  %s1819_s5 = int_to_ptr.hbm [resolvable:$true] %s1818_s5 }
  0xff   : > { %v548_v36 = vmul.f32 %v3210_v28, %v503_v32  ;;  %v529_v51 = vmul.f32 %v3210_v28, %v465_v47  ;;  %v501_v54 = vpop.xlane.xlu1 %500  ;;  %v2122_v32 = vld [vmem:[#allocation7 + $0x74] sm:$0xf0]  ;;  %s2704_s13 = sshra.s32 %s1819_s5, 4  ;;  %s2705_s13 = int_to_ptr.hbm [resolvable:$true] %s2704_s13 }
 0x100   : > { %v547_v58 = vmul.f32 %v3210_v28, %v501_v54  ;;  %s2706_s11 = scalar_lea.hbm %s2705_s13, 128  ;;  %p2711_p8 = scmp.lt.s32.totalorder %s2705_s13, %s4340_s2 }
 0x101   : > { %v3313_v12 = vsub.f32 %v3183_v15, %v548_v36  ;;  %v3334_v53 = vsub.f32 %v3186_v16, %v529_v51  ;;  %v2120_v36 = vld [vmem:[#allocation7 + $0x64] sm:$0xf0]  ;;  %p2707_p3 = scmp.ne.s32.totalorder %s2705_s13, %s2706_s11  ;;  %p2712_p10 = scmp.lt.s32.totalorder %s2710_s17, %s2706_s11 }
 0x102   : > { %v3346_v16 = vsub.f32 %v3189_v17, %v547_v58  ;;  %v2115_v58 = vld [vmem:[#allocation7 + $0x44] sm:$0xf] }
 0x103   : > { %v612_v48 = vmul.f32 %v3313_v12, %v3313_v12  ;;  %v593_v57 = vmul.f32 %v3334_v53, %v3334_v53  ;;  %p2708_p5 = pnand %p2707_p3, %p3074_p1  ;;  %p2713_p0 = por %p2712_p10, %p2711_p8 }
 0x104   : > { %v611_v2 = vmul.f32 %v3346_v16, %v3346_v16 }
 0x105   : > { %476 = vadd.xlane.f32.xlu0 %v3290_v29  ;;  %659 = vadd.xlane.f32.xlu1 %v607_v31  ;;  %v2089_v31 = vld [vmem:[#allocation7 + $0x70] sm:$0xf]  ;;  %p2709_p6 = pneg %p2708_p5 }
 0x106   : > { %627 = vadd.xlane.f32.xlu2 %v591_v30  ;;  %v469_v46 = vpop.xlane.xlu2 %468  ;;  %v471_v61 = vpop.xlane.xlu0 %470  ;;  %v2090_v7 = vor.u32 %v2122_v32, %v2089_v31  ;;  %v2112_v31 = vld [vmem:[#allocation7 + $0x24] sm:$0xf0]  ;;  %v2111_v32 = vld [vmem:[#allocation7 + $0x24] sm:$0xf] }
 0x107   : > { %v531_v15 = vmul.f32 %v3210_v28, %v469_v46  ;;  %v507_v17 = vpop.xlane.xlu1 %506  ;;  %v2083_v46 = vld [vmem:[#allocation7 + $0x68] sm:$0xf0]  ;;  %p2714_p2 = pnand %p2713_p0, %p2709_p6 }
 0x108   : > { %v550_v9 = vmul.f32 %v3210_v28, %v507_v17  ;;  %2313 = vmatpush.bf16.msra.mxu2 %v2090_v7  ;;  %1247 = vmatpush.bf16.msra.mxu0 %v2090_v7  ;;  %v2086_v47 = vor.u32 %v2119_v37, %v2083_v46  ;;  %v2114_v17 = vld [vmem:[#allocation7 + $0x34] sm:$0xf0]  ;;  %v2051_v7 = vld [vmem:[#allocation7 + $0x28] sm:$0xf0] }
 0x109   : > { %v3331_v14 = vsub.f32 %v3195_v18, %v531_v15  ;;  %v532_v18 = vmul.f32 %v3210_v28, %v471_v61  ;;  %v2117_v15 = vld [vmem:[#allocation7 + $0x54] sm:$0xf] }
 0x10b   : > { %v595_v56 = vmul.f32 %v3331_v14, %v3331_v14  ;;  %v3359_v6 = vsub.f32 %v3198_v19, %v532_v18  ;;  %v3374_v19 = vsub.f32 %v3201_v20, %v550_v9  ;;  %v2081_v20 = vld [vmem:[#allocation7 + $0x60] sm:$0xf]  ;;  %v2067_v18 = vld [vmem:[#allocation7 + $0x48] sm:$0xf0]  ;;  %v2059_v9 = vld [vmem:[#allocation7 + $0x38] sm:$0xf0] }
 0x10c   : > { %v2082_v39 = vor.u32 %v2120_v36, %v2081_v20  ;;  %v2110_v20 = vld [vmem:[#allocation7 + $0x14] sm:$0xf0]  ;;  %v2109_v36 = vld [vmem:[#allocation7 + $0x14] sm:$0xf] }
 0x10d   : > { %663 = vadd.xlane.f32.xlu0 %v609_v35  ;;  %478 = vadd.xlane.f32.xlu1 %v3305_v38  ;;  %v596_v23 = vmul.f32 %v3359_v6, %v3359_v6  ;;  %v614_v30 = vmul.f32 %v3374_v19, %v3374_v19  ;;  %v2091_v35 = vld [vmem:[#allocation7 + $0x78] sm:$0xf0] }
 0x10e   : > { %508 = vadd.xlane.f32.xlu2 %v3309_v40  ;;  %v505_v22 = vpop.xlane.xlu0 %504  ;;  %2314 = vmatpush.bf16.msra.mxu2 %v2082_v39 }
 0x10f   : > { %v549_v24 = vmul.f32 %v3210_v28, %v505_v22  ;;  %1248 = vmatpush.bf16.msra.mxu0 %v2082_v39  ;;  %v2057_v22 = vld [vmem:[#allocation7 + $0x30] sm:$0xf]  ;;  %v2043_v39 = vld [vmem:[#allocation7 + $0x18] sm:$0xf0] }
 0x110   : > { %v2046_v46 = vor.u32 %v2109_v36, %v2043_v39 }
 0x111   : > { %v3370_v8 = vsub.f32 %v3207_v21, %v549_v24  ;;  %v2094_v21 = vor.u32 %v2121_v34, %v2091_v35  ;;  %v2058_v24 = vor.u32 %v2114_v17, %v2057_v22  ;;  %v2054_v35 = vor.u32 %v2111_v32, %v2051_v7 }
 0x113   : > { %v613_v27 = vmul.f32 %v3370_v8, %v3370_v8  ;;  %2321 = vmatpush.bf16.msra.mxu3 %v2094_v21  ;;  %1336 = vmatpush.bf16.msra.mxu1 %v2094_v21  ;;  %v2041_v21 = vld [vmem:[#allocation7 + $0x10] sm:$0xf] }
 0x114   : > { %v2042_v37 = vor.u32 %v2110_v20, %v2041_v21 }
 0x115   : > { %669 = vadd.xlane.f32.xlu0 %v612_v48  ;;  %665 = vadd.xlane.f32.xlu1 %v610_v49  ;;  %v2073_v48 = vld [vmem:[#allocation7 + $0x50] sm:$0xf]  ;;  %v2118_v49 = vld [vmem:[#allocation7 + $0x54] sm:$0xf0] }
 0x116   : > { %633 = vadd.xlane.f32.xlu2 %v594_v13  ;;  %v2074_v51 = vor.u32 %v2118_v49, %v2073_v48  ;;  %v2075_v13 = vld [vmem:[#allocation7 + $0x58] sm:$0xf0]  ;;  %v2033_v49 = vld [vmem:[#allocation7] sm:$0xf] }
 0x117   : > { %2322 = vmatpush.bf16.msra.mxu3 %v2086_v47  ;;  %1337 = vmatpush.bf16.msra.mxu1 %v2086_v47  ;;  %v2078_v54 = vor.u32 %v2117_v15, %v2075_v13  ;;  %v2108_v15 = vld [vmem:[#allocation7 + $0x4] sm:$0xf0] }
 0x118   : > { %2315 = vmatpush.bf16.msra.mxu2 %v2074_v51  ;;  %1249 = vmatpush.bf16.msra.mxu0 %v2074_v51  ;;  %v2107_v51 = vld [vmem:[#allocation7 + $0x4] sm:$0xf]  ;;  %v2034_v13 = vor.u32 %v2108_v15, %v2033_v49 }
 0x11b   : > { %2323 = vmatpush.bf16.msra.mxu3 %v2078_v54  ;;  %1338 = vmatpush.bf16.msra.mxu1 %v2078_v54  ;;  %v2035_v54 = vld [vmem:[#allocation7 + $0x8] sm:$0xf0] }
 0x11d   : > { %635 = vadd.xlane.f32.xlu0 %v595_v56  ;;  %631 = vadd.xlane.f32.xlu1 %v593_v57  ;;  %v2065_v56 = vld [vmem:[#allocation7 + $0x40] sm:$0xf]  ;;  %v2116_v57 = vld [vmem:[#allocation7 + $0x44] sm:$0xf0] }
 0x11e   : > { %514 = vadd.xlane.f32.xlu2 %v3342_v59  ;;  %v2066_v61 = vor.u32 %v2116_v57, %v2065_v56  ;;  %v2038_v57 = vor.u32 %v2107_v51, %v2035_v54 }
 0x120   : > { %2316 = vmatpush.bf16.msra.mxu2 %v2066_v61  ;;  %1250 = vmatpush.bf16.msra.mxu0 %v2066_v61 }
 0x124   : > { %2317 = vmatpush.bf16.msra.mxu2 %v2058_v24  ;;  %1251 = vmatpush.bf16.msra.mxu0 %v2058_v24 }
 0x125   : > { %512 = vadd.xlane.f32.xlu1 %v3350_v62  ;;  %482 = vadd.xlane.f32.xlu0 %v3355_v3 }
 0x126   : > { %667 = vadd.xlane.f32.xlu2 %v611_v2  ;;  %v2070_v2 = vor.u32 %v2115_v58, %v2067_v18 }
 0x128   : > { %2324 = vmatpush.bf16.msra.mxu3 %v2070_v2  ;;  %1339 = vmatpush.bf16.msra.mxu1 %v2070_v2 }
 0x12d   : > { %637 = vadd.xlane.f32.xlu1 %v596_v23  ;;  %v2113_v23 = vld [vmem:[#allocation7 + $0x34] sm:$0xf] }
 0x12e   : > { %480 = vadd.xlane.f32.xlu2 %v3367_v25 }
 0x135   : > { %671 = vadd.xlane.f32.xlu1 %v613_v27  ;;  %v2062_v27 = vor.u32 %v2113_v23, %v2059_v9 }
 0x136   : > { %673 = vadd.xlane.f32.xlu2 %v614_v30  ;;  %v2049_v30 = vld [vmem:[#allocation7 + $0x20] sm:$0xf] }
 0x137   : > { %2325 = vmatpush.bf16.msra.mxu3 %v2062_v27  ;;  %1340 = vmatpush.bf16.msra.mxu1 %v2062_v27  ;;  %v2050_v34 = vor.u32 %v2112_v31, %v2049_v30 }
 0x139   : > { %2318 = vmatpush.bf16.msra.mxu2 %v2050_v34  ;;  %1252 = vmatpush.bf16.msra.mxu0 %v2050_v34 }
 0x13b   : > { %2326 = vmatpush.bf16.msra.mxu3 %v2054_v35  ;;  %1341 = vmatpush.bf16.msra.mxu1 %v2054_v35 }
 0x13d   : > { %2319 = vmatpush.bf16.msra.mxu2 %v2042_v37  ;;  %1253 = vmatpush.bf16.msra.mxu0 %v2042_v37 }
 0x13f   : > { %2327 = vmatpush.bf16.msra.mxu3 %v2046_v46  ;;  %1342 = vmatpush.bf16.msra.mxu1 %v2046_v46 }
 0x141   : > { %2320 = vmatpush.bf16.msra.mxu2 %v2034_v13  ;;  %1254 = vmatpush.bf16.msra.mxu0 %v2034_v13 }
 0x143   : > { %2328 = vmatpush.bf16.msra.mxu3 %v2038_v57  ;;  %1343 = vmatpush.bf16.msra.mxu1 %v2038_v57 }
 0x150   : > { %v652_v47 = vpop.xlane.xlu0 %651 }
 0x151   : > { %v699_v48 = vmul.f32 %v652_v47, %v3210_v28 }
 0x153   : > { %v731_v56 = vadd.f32 1e-05, %v699_v48 }
 0x155   : > { %2475 = vrsqrt.f32 %v731_v56  ;;  %vm913_vm2 = vweird.f32 %v731_v56 }
 0x158   : > { %v658_v58 = vpop.xlane.xlu0 %657  ;;  %v654_v61 = vpop.xlane.xlu1 %653 }
 0x159   : > { %v702_v18 = vmul.f32 %v658_v58, %v3210_v28  ;;  %v622_v2 = vpop.xlane.xlu2 %621  ;;  %v700_v22 = vmul.f32 %v654_v61, %v3210_v28 }
 0x15a   : > { %v684_v17 = vmul.f32 %v622_v2, %v3210_v28 }
 0x15b   : > { %v3384_v23 = vpop.eup %2475  ;;  %v3386_v24 = vadd.f32 1e-05, %v702_v18  ;;  %v732_v9 = vadd.f32 1e-05, %v700_v22 }
 0x15c   : > { %v908_v27 = vmul.f32 %v3384_v23, %v731_v56  ;;  %v3389_v30 = vadd.f32 1e-05, %v684_v17  ;;  %vm914_vm1 = vweird.f32 %v3384_v23 }
 0x15d   : > { %2477 = vrsqrt.f32 %v3386_v24  ;;  %vm3429_vm4 = vmor %vm913_vm2, %vm914_vm1  ;;  %vm923_vm5 = vweird.f32 %v732_v9  ;;  %vm943_vm6 = vweird.f32 %v3386_v24 }
 0x15e   : > { %v909_v31 = vmul.f32 %v3384_v23, %v908_v27  ;;  %2479 = vrsqrt.f32 %v3389_v30  ;;  %vm763_vm11 = vweird.f32 %v3389_v30 }
 0x15f   : > { %2481 = vrsqrt.f32 %v732_v9 }
 0x160   : > { %v624_v32 = vpop.xlane.xlu0 %623  ;;  %v620_v34 = vpop.xlane.xlu1 %619  ;;  %v910_v7 = vmul.f32 0.5, %v909_v31 }
 0x161   : > { %v685_v35 = vmul.f32 %v624_v32, %v3210_v28  ;;  %v475_v21 = vpop.xlane.xlu2 %474  ;;  %v683_v20 = vmul.f32 %v620_v34, %v3210_v28 }
 0x162   : > { %v534_v36 = vmul.f32 %v3210_v28, %v475_v21  ;;  %v911_v51 = vsub.f32 1.5, %v910_v7 }
 0x163   : > { %v3397_v37 = vpop.eup %2477  ;;  %v3399_v39 = vadd.f32 1e-05, %v685_v35  ;;  %v3401_v46 = vadd.f32 1e-05, %v683_v20 }
 0x164   : > { %v3403_v47 = vpop.eup %2479  ;;  %v938_v48 = vmul.f32 %v3397_v37, %v3386_v24  ;;  %v3408_v49 = vsub.f32 %v3245_v55, %v534_v36  ;;  %v912_v22 = vmul.f32 %v3384_v23, %v911_v51  ;;  %vm944_vm10 = vweird.f32 %v3397_v37 }
 0x165   : > { %v2482_v15 = vpop.eup %2481  ;;  %v758_v13 = vmul.f32 %v3403_v47, %v3389_v30  ;;  %2483 = vrsqrt.f32 %v3399_v39  ;;  %vm764_vm7 = vweird.f32 %v3403_v47  ;;  %vm753_vm13 = vweird.f32 %v3401_v46  ;;  %vm3507_vm0 = vmor %vm943_vm6, %vm944_vm10 }
 0x166   : > { %v918_v54 = vmul.f32 %v2482_v15, %v732_v9  ;;  %2485 = vrsqrt.f32 %v3401_v46  ;;  %v598_v58 = vmul.f32 %v3408_v49, %v3408_v49  ;;  %v939_v61 = vmul.f32 %v3397_v37, %v938_v48  ;;  %vm3478_vm12 = vmor %vm763_vm11, %vm764_vm7 }
 0x167   : > { %v759_v57 = vmul.f32 %v3403_v47, %v758_v13  ;;  %vm924_vm3 = vweird.f32 %v2482_v15  ;;  %vm773_vm15 = vweird.f32 %v3399_v39 }
 0x168   : > { %v919_v18 = vmul.f32 %v2482_v15, %v918_v54  ;;  %v511_v55 = vpop.xlane.xlu0 %510  ;;  %v473_v2 = vpop.xlane.xlu1 %472  ;;  %641 = vadd.xlane.f32.xlu1 %v598_v58  ;;  %v940_v36 = vmul.f32 0.5, %v939_v61  ;;  %vm925_vm8 = vmor %vm923_vm5, %vm924_vm3 }
 0x169   : > { %v656_v17 = vpop.xlane.xlu2 %655  ;;  %v533_v27 = vmul.f32 %v3210_v28, %v473_v2  ;;  %v760_v31 = vmul.f32 0.5, %v759_v57  ;;  %v552_v13 = vmul.f32 %v3210_v28, %v511_v55 }
 0x16a   : > { %v920_v32 = vmul.f32 0.5, %v919_v18  ;;  %v701_v34 = vmul.f32 %v656_v17, %v3210_v28  ;;  %v941_v55 = vsub.f32 1.5, %v940_v36 }
 0x16b   : > { %v3422_v7 = vpop.eup %2483  ;;  %v3425_v35 = vsub.f32 %v3258_v1, %v533_v27  ;;  %v916_v1 = vsel %vm3429_vm4, %v3384_v23, %v912_v22  ;;  %v761_v57 = vsub.f32 1.5, %v760_v31  ;;  %v3452_v23 = vsub.f32 %v3255_v63, %v552_v13 }
 0x16c   : > { %v3427_v21 = vpop.eup %2485  ;;  %v921_v48 = vsub.f32 1.5, %v920_v32  ;;  %v768_v51 = vmul.f32 %v3422_v7, %v3399_v39  ;;  %v3438_v54 = vadd.f32 1e-05, %v701_v34  ;;  %v1083_v27 = vmul.f32 %v916_v1, %v3213_v33 }
 0x16d   : > { %v748_v56 = vmul.f32 %v3427_v21, %v3401_v46  ;;  %v597_v18 = vmul.f32 %v3425_v35, %v3425_v35  ;;  %v762_v36 = vmul.f32 %v3403_v47, %v761_v57  ;;  %vm754_vm9 = vweird.f32 %v3427_v21 }
 0x16e   : > { %v922_v58 = vmul.f32 %v2482_v15, %v921_v48  ;;  %v769_v61 = vmul.f32 %v3422_v7, %v768_v51  ;;  %2487 = vrsqrt.f32 %v3438_v54  ;;  %v3458_v51 = vld [vmem:[#allocation5] ss:$0 sm:$0xff]  ;;  %v616_v57 = vmul.f32 %v3452_v23, %v3452_v23  ;;  %vm755_vm14 = vmor %vm753_vm13, %vm754_vm9 }
 0x16f   : > { %v749_v9 = vmul.f32 %v3427_v21, %v748_v56  ;;  %639 = vadd.xlane.f32.xlu0 %v597_v18  ;;  %v1119_v30 = vmul.f32 %v3458_v51, %v1083_v27  ;;  %vm774_vm1 = vweird.f32 %v3422_v7  ;;  %vm933_vm4 = vweird.f32 %v3438_v54 }
 0x170   : > { %v630_v2 = vpop.xlane.xlu0 %629  ;;  %v626_v22 = vpop.xlane.xlu1 %625  ;;  %v926_v17 = vsel %vm925_vm8, %v2482_v15, %v922_v58  ;;  %v770_v63 = vmul.f32 0.5, %v769_v61  ;;  %vm3534_vm3 = vmor %vm773_vm15, %vm774_vm1 }
 0x171   : > { %v750_v31 = vmul.f32 0.5, %v749_v9  ;;  %v688_v32 = vmul.f32 %v630_v2, %v3210_v28  ;;  %v662_v34 = vpop.xlane.xlu2 %661  ;;  %v686_v20 = vmul.f32 %v626_v22, %v3210_v28  ;;  %v1084_v48 = vmul.f32 %v926_v17, %v3222_v42 }
 0x172   : > { %v704_v13 = vmul.f32 %v662_v34, %v3210_v28  ;;  %v771_v9 = vsub.f32 1.5, %v770_v63  ;;  %v766_v22 = vsel %vm3478_vm12, %v3403_v47, %v762_v36  ;;  %v942_v17 = vmul.f32 %v3397_v37, %v941_v55 }
 0x173   : > { %v751_v15 = vsub.f32 1.5, %v750_v31  ;;  %v3463_v56 = vadd.f32 1e-05, %v688_v32  ;;  %v3465_v33 = vadd.f32 1e-05, %v686_v20  ;;  %v1120_v1 = vmul.f32 %v3458_v51, %v1084_v48 }
 0x174   : > { %v3470_v42 = vadd.f32 1e-05, %v704_v13  ;;  %v3474_v58 = vpop.eup %2487  ;;  %v1068_v36 = vmul.f32 %v766_v22, %v3224_v43  ;;  %v946_v24 = vsel %vm3507_vm0, %v3397_v37, %v942_v17 }
 0x175   : > { %v752_v18 = vmul.f32 %v3427_v21, %v751_v15  ;;  %2489 = vrsqrt.f32 %v3463_v56  ;;  %v928_v2 = vmul.f32 %v3474_v58, %v3438_v54  ;;  %v1143_v46 = vpack.c.bf16 %v1120_v1, %v1119_v30 }
 0x176   : > { %2491 = vrsqrt.f32 %v3470_v42  ;;  %vm934_vm2 = vweird.f32 %v3474_v58  ;;  %vm783_vm6 = vweird.f32 %v3465_v33  ;;  %vm963_vm8 = vweird.f32 %v3470_v42 }
 0x177   : > { %2493 = vrsqrt.f32 %v3465_v33  ;;  %v756_v27 = vsel %vm755_vm14, %v3427_v21, %v752_v18  ;;  %v929_v31 = vmul.f32 %v3474_v58, %v928_v2  ;;  %677 = vadd.xlane.f32.xlu0 %v616_v57  ;;  %1295 = vmatmul.bf16.vlgmr.msra.gmra.mxu2 %v1143_v46  ;;  %vm935_vm5 = vmor %vm933_vm4, %vm934_vm2  ;;  %vm803_vm0 = vweird.f32 %v3463_v56 }
 0x178   : > { %v477_v32 = vpop.xlane.xlu0 %476  ;;  %v660_v34 = vpop.xlane.xlu1 %659  ;;  %v1067_v20 = vmul.f32 %v756_v27, %v3234_v50  ;;  %1384 = vmatmul.bf16.vlgmr.msra.gmra.mxu3 %v1143_v46  ;;  %v772_v50 = vmul.f32 %v3422_v7, %v771_v9 }
 0x179   : > { %v535_v47 = vmul.f32 %v3210_v28, %v477_v32  ;;  %v628_v48 = vpop.xlane.xlu2 %627  ;;  %v703_v55 = vmul.f32 %v660_v34, %v3210_v28  ;;  %v930_v63 = vmul.f32 0.5, %v929_v31  ;;  %v1086_v31 = vmul.f32 %v946_v24, %v3220_v41 }
 0x17a   : > { %v687_v13 = vmul.f32 %v628_v48, %v3210_v28  ;;  %v1103_v43 = vmul.f32 %v3458_v51, %v1067_v20  ;;  %v776_v46 = vsel %vm3534_vm3, %v3422_v7, %v772_v50 }
 0x17b   : > { %v3514_v15 = vpop.eup %2489  ;;  %v3516_v1 = vadd.f32 1e-05, %v703_v55  ;;  %v931_v61 = vsub.f32 1.5, %v930_v63  ;;  %v3526_v18 = vsub.f32 %v3290_v29, %v535_v47  ;;  %v1104_v29 = vmul.f32 %v3458_v51, %v1068_v36 }
 0x17c   : > { %v3522_v57 = vpop.eup %2491  ;;  %v3528_v30 = vadd.f32 1e-05, %v687_v13  ;;  %v798_v17 = vmul.f32 %v3514_v15, %v3463_v56  ;;  %v1069_v50 = vmul.f32 %v776_v46, %v3238_v52  ;;  %vm804_vm2 = vweird.f32 %v3514_v15 }
 0x17d   : > { %v3530_v9 = vpop.eup %2493  ;;  %v958_v37 = vmul.f32 %v3522_v57, %v3470_v42  ;;  %2495 = vrsqrt.f32 %v3516_v1  ;;  %v932_v22 = vmul.f32 %v3474_v58, %v931_v61  ;;  %v1135_v27 = vpack.c.bf16 %v1104_v29, %v1103_v43  ;;  %vm3672_vm4 = vmor %vm803_vm0, %vm804_vm2 }
 0x17e   : > { %v778_v39 = vmul.f32 %v3530_v9, %v3465_v33  ;;  %2497 = vrsqrt.f32 %v3528_v30  ;;  %v599_v34 = vmul.f32 %v3526_v18, %v3526_v18  ;;  %v799_v41 = vmul.f32 %v3514_v15, %v798_v17 }
 0x17f   : > { %v959_v54 = vmul.f32 %v3522_v57, %v958_v37  ;;  %v936_v48 = vsel %vm935_vm5, %v3474_v58, %v932_v22  ;;  %1255 = vmatmul.bf16.vlgmr.msra.gmra.mxu0 %v1135_v27  ;;  %1344 = vmatmul.bf16.vlgmr.msra.gmra.mxu1 %v1135_v27  ;;  %v1122_v61 = vmul.f32 %v3458_v51, %v1086_v31  ;;  %vm784_vm7 = vweird.f32 %v3530_v9 }
 0x180   : > { %v779_v32 = vmul.f32 %v3530_v9, %v778_v39  ;;  %v664_v20 = vpop.xlane.xlu0 %663  ;;  %v479_v47 = vpop.xlane.xlu1 %478  ;;  %v1085_v21 = vmul.f32 %v936_v48, %v3250_v60  ;;  %643 = vadd.xlane.f32.xlu1 %v599_v34  ;;  %v1105_v22 = vmul.f32 %v3458_v51, %v1069_v50  ;;  %v800_v17 = vmul.f32 0.5, %v799_v41  ;;  %vm3588_vm10 = vmor %vm783_vm6, %vm784_vm7 }
 0x181   : > { %v960_v55 = vmul.f32 0.5, %v959_v54  ;;  %v705_v7 = vmul.f32 %v664_v20, %v3210_v28  ;;  %v509_v36 = vpop.xlane.xlu2 %508  ;;  %vm964_vm9 = vweird.f32 %v3522_v57  ;;  %vm953_vm11 = vweird.f32 %v3516_v1 }
 0x182   : > { %v780_v63 = vmul.f32 0.5, %v779_v32  ;;  %v551_v13 = vmul.f32 %v3210_v28, %v509_v36  ;;  %v1121_v24 = vmul.f32 %v3458_v51, %v1085_v21  ;;  %v801_v41 = vsub.f32 1.5, %v800_v17  ;;  %vm3617_vm13 = vmor %vm963_vm8, %vm964_vm9 }
 0x183   : > { %v3563_v43 = vpop.eup %2495  ;;  %v3566_v58 = vadd.f32 1e-05, %v705_v7  ;;  %v961_v2 = vsub.f32 1.5, %v960_v55  ;;  %vm793_vm1 = vweird.f32 %v3528_v30 }
 0x184   : > { %v781_v60 = vsub.f32 1.5, %v780_v63  ;;  %v948_v52 = vmul.f32 %v3563_v43, %v3516_v1  ;;  %v3573_v37 = vpop.eup %2497  ;;  %v3578_v29 = vsub.f32 %v3309_v40, %v551_v13  ;;  %v536_v40 = vmul.f32 %v3210_v28, %v479_v47 }
 0x185   : > { %2499 = vrsqrt.f32 %v3566_v58  ;;  %v788_v46 = vmul.f32 %v3573_v37, %v3528_v30  ;;  %v1144_v31 = vpack.c.bf16 %v1122_v61, %v1121_v24  ;;  %v962_v34 = vmul.f32 %v3522_v57, %v961_v2 }
 0x186   : > { %v782_v39 = vmul.f32 %v3530_v9, %v781_v60  ;;  %v949_v54 = vmul.f32 %v3563_v43, %v948_v52  ;;  %v615_v32 = vmul.f32 %v3578_v29, %v3578_v29  ;;  %vm954_vm12 = vweird.f32 %v3563_v43 }
 0x187   : > { %v789_v20 = vmul.f32 %v3573_v37, %v788_v46  ;;  %1300 = vmatmul.bf16.gmra.mxu2 %v1144_v31  ;;  %v3625_v46 = vsub.f32 %v3305_v38, %v536_v40  ;;  %vm794_vm14 = vweird.f32 %v3573_v37  ;;  %v966_v42 = vsel %vm3617_vm13, %v3522_v57, %v962_v34  ;;  %vm955_vm15 = vmor %vm953_vm11, %vm954_vm12 }
 0x188   : > { %v950_v48 = vmul.f32 0.5, %v949_v54  ;;  %v670_v55 = vpop.xlane.xlu0 %669  ;;  %v666_v7 = vpop.xlane.xlu1 %665  ;;  %v786_v33 = vsel %vm3588_vm10, %v3530_v9, %v782_v39  ;;  %1389 = vmatmul.bf16.gmra.mxu3 %v1144_v31  ;;  %675 = vadd.xlane.f32.xlu2 %v615_v32  ;;  %vm3651_vm3 = vmor %vm793_vm1, %vm794_vm14  ;;  %vm973_vm5 = vweird.f32 %v3566_v58 }
 0x189   : > { %v708_v47 = vmul.f32 %v670_v55, %v3210_v28  ;;  %v634_v36 = vpop.xlane.xlu2 %633  ;;  %v706_v21 = vmul.f32 %v666_v7, %v3210_v28  ;;  %v1070_v50 = vmul.f32 %v786_v33, %v3269_v4  ;;  %v790_v63 = vmul.f32 0.5, %v789_v20 }
 0x18a   : > { %v951_v13 = vsub.f32 1.5, %v950_v48  ;;  %v690_v24 = vmul.f32 %v634_v36, %v3210_v28  ;;  %v600_v57 = vmul.f32 %v3625_v46, %v3625_v46  ;;  %v1088_v48 = vmul.f32 %v966_v42, %v3272_v5 }
 0x18b   : > { %v3605_v61 = vpop.eup %2499  ;;  %v3608_v9 = vadd.f32 1e-05, %v708_v47  ;;  %v3610_v2 = vadd.f32 1e-05, %v706_v21  ;;  %v1106_v60 = vmul.f32 %v3458_v51, %v1070_v50  ;;  %v791_v52 = vsub.f32 1.5, %v790_v63 }
 0x18c   : > { %v952_v17 = vmul.f32 %v3563_v43, %v951_v13  ;;  %v968_v39 = vmul.f32 %v3605_v61, %v3566_v58  ;;  %v3629_v54 = vadd.f32 1e-05, %v690_v24  ;;  %v1124_v13 = vmul.f32 %v3458_v51, %v1088_v48 }
 0x18d   : > { %2501 = vrsqrt.f32 %v3608_v9  ;;  %v792_v27 = vmul.f32 %v3573_v37, %v791_v52  ;;  %v1136_v38 = vpack.c.bf16 %v1106_v60, %v1105_v22  ;;  %v802_v22 = vmul.f32 %v3514_v15, %v801_v41 }
 0x18e   : > { %v969_v31 = vmul.f32 %v3605_v61, %v968_v39  ;;  %2503 = vrsqrt.f32 %v3610_v2  ;;  %v956_v40 = vsel %vm955_vm15, %v3563_v43, %v952_v17  ;;  %vm974_vm6 = vweird.f32 %v3605_v61 }
 0x18f   : > { %2505 = vrsqrt.f32 %v3629_v54  ;;  %v1087_v20 = vmul.f32 %v956_v40, %v3286_v26  ;;  %1260 = vmatmul.bf16.gmra.mxu0 %v1136_v38  ;;  %1349 = vmatmul.bf16.gmra.mxu1 %v1136_v38  ;;  %v796_v26 = vsel %vm3651_vm3, %v3573_v37, %v792_v27  ;;  %v806_v56 = vsel %vm3672_vm4, %v3514_v15, %v802_v22  ;;  %vm3705_vm7 = vmor %vm973_vm5, %vm974_vm6 }
 0x190   : > { %v970_v32 = vmul.f32 0.5, %v969_v31  ;;  %v636_v34 = vpop.xlane.xlu0 %635  ;;  %v632_v1 = vpop.xlane.xlu1 %631  ;;  %645 = vadd.xlane.f32.xlu2 %v600_v57  ;;  %v1071_v52 = vmul.f32 %v796_v26, %v3283_v10  ;;  %v1072_v38 = vmul.f32 %v806_v56, %v3266_v0  ;;  %vm983_vm9 = vweird.f32 %v3610_v2 }
 0x191   : > { %v691_v43 = vmul.f32 %v636_v34, %v3210_v28  ;;  %v515_v55 = vpop.xlane.xlu2 %514  ;;  %v689_v7 = vmul.f32 %v632_v1, %v3210_v28  ;;  %v1123_v50 = vmul.f32 %v3458_v51, %v1087_v20  ;;  %vm823_vm12 = vweird.f32 %v3629_v54 }
 0x192   : > { %v554_v5 = vmul.f32 %v3210_v28, %v515_v55  ;;  %v971_v47 = vsub.f32 1.5, %v970_v32  ;;  %v1107_v48 = vmul.f32 %v3458_v51, %v1071_v52  ;;  %vm1003_vm0 = vweird.f32 %v3608_v9 }
 0x193   : > { %v3661_v33 = vpop.eup %2501  ;;  %v3663_v36 = vadd.f32 1e-05, %v691_v43  ;;  %v3665_v21 = vadd.f32 1e-05, %v689_v7  ;;  %v1145_v42 = vpack.c.bf16 %v1124_v13, %v1123_v50 }
 0x194   : > { %v2504_v41 = vpop.eup %2503  ;;  %v3678_v37 = vsub.f32 %v3342_v59, %v554_v5  ;;  %v998_v4 = vmul.f32 %v3661_v33, %v3608_v9  ;;  %v972_v17 = vmul.f32 %v3605_v61, %v971_v47  ;;  %v1108_v5 = vmul.f32 %v3458_v51, %v1072_v38 }
 0x195   : > { %v3681_v24 = vpop.eup %2505  ;;  %v978_v60 = vmul.f32 %v2504_v41, %v3610_v2  ;;  %2507 = vrsqrt.f32 %v3663_v36  ;;  %vm984_vm8 = vweird.f32 %v2504_v41  ;;  %vm813_vm15 = vweird.f32 %v3665_v21 }
 0x196   : > { %v818_v59 = vmul.f32 %v3681_v24, %v3629_v54  ;;  %2509 = vrsqrt.f32 %v3665_v21  ;;  %v618_v27 = vmul.f32 %v3678_v37, %v3678_v37  ;;  %v999_v1 = vmul.f32 %v3661_v33, %v998_v4  ;;  %vm985_vm10 = vmor %vm983_vm9, %vm984_vm8 }
 0x197   : > { %v979_v39 = vmul.f32 %v2504_v41, %v978_v60  ;;  %1305 = vmatmul.bf16.gmra.mxu2 %v1145_v42  ;;  %v976_v58 = vsel %vm3705_vm7, %v3605_v61, %v972_v17  ;;  %vm824_vm11 = vweird.f32 %v3681_v24  ;;  %vm1004_vm1 = vweird.f32 %v3661_v33 }
 0x198   : > { %v819_v31 = vmul.f32 %v3681_v24, %v818_v59  ;;  %v513_v15 = vpop.xlane.xlu1 %512  ;;  %1394 = vmatmul.bf16.gmra.mxu3 %v1145_v42  ;;  %v483_v34 = vpop.xlane.xlu0 %482  ;;  %681 = vadd.xlane.f32.xlu1 %v618_v27  ;;  %v1000_v13 = vmul.f32 0.5, %v999_v1  ;;  %v1089_v61 = vmul.f32 %v976_v58, %v3298_v11  ;;  %vm3745_vm13 = vmor %vm823_vm12, %vm824_vm11  ;;  %vm833_vm6 = vweird.f32 %v3663_v36 }
 0x199   : > { %v980_v40 = vmul.f32 0.5, %v979_v39  ;;  %v668_v32 = vpop.xlane.xlu2 %667  ;;  %v553_v57 = vmul.f32 %v3210_v28, %v513_v15  ;;  %v538_v26 = vmul.f32 %v3210_v28, %v483_v34  ;;  %vm3772_vm3 = vmor %vm1003_vm0, %vm1004_vm1 }
 0x19a   : > { %v820_v20 = vmul.f32 0.5, %v819_v31  ;;  %v707_v0 = vmul.f32 %v668_v32, %v3210_v28  ;;  %v1125_v15 = vmul.f32 %v3458_v51, %v1089_v61 }
 0x19b   : > { %v3712_v22 = vpop.eup %2507  ;;  %v981_v30 = vsub.f32 1.5, %v980_v40  ;;  %v3715_v43 = vsub.f32 %v3350_v62, %v553_v57  ;;  %v1137_v62 = vpack.c.bf16 %v1108_v5, %v1107_v48  ;;  %v3735_v52 = vsub.f32 %v3355_v3, %v538_v26 }
 0x19c   : > { %v2510_v55 = vpop.eup %2509  ;;  %v821_v7 = vsub.f32 1.5, %v820_v20  ;;  %v3724_v63 = vadd.f32 1e-05, %v707_v0  ;;  %v828_v56 = vmul.f32 %v3712_v22, %v3663_v36  ;;  %vm834_vm7 = vweird.f32 %v3712_v22 }
 0x19d   : > { %v982_v47 = vmul.f32 %v2504_v41, %v981_v30  ;;  %v808_v50 = vmul.f32 %v2510_v55, %v3665_v21  ;;  %v617_v60 = vmul.f32 %v3715_v43, %v3715_v43  ;;  %vm814_vm14 = vweird.f32 %v2510_v55  ;;  %vm835_vm11 = vmor %vm833_vm6, %vm834_vm7 }
 0x19e   : > { %2511 = vrsqrt.f32 %v3724_v63  ;;  %v822_v2 = vmul.f32 %v3681_v24, %v821_v7  ;;  %v602_v57 = vmul.f32 %v3735_v52, %v3735_v52  ;;  %vm815_vm2 = vmor %vm813_vm15, %vm814_vm14  ;;  %vm993_vm5 = vweird.f32 %v3724_v63 }
 0x19f   : > { %v809_v4 = vmul.f32 %v2510_v55, %v808_v50  ;;  %v986_v59 = vsel %vm985_vm10, %v2504_v41, %v982_v47  ;;  %679 = vadd.xlane.f32.xlu0 %v617_v60  ;;  %1265 = vmatmul.bf16.gmra.mxu0 %v1137_v62  ;;  %v1001_v41 = vsub.f32 1.5, %v1000_v13 }
 0x1a0   : > { %v638_v17 = vpop.xlane.xlu1 %637  ;;  %v1090_v39 = vmul.f32 %v986_v59, %v3316_v44  ;;  %1354 = vmatmul.bf16.gmra.mxu1 %v1137_v62  ;;  %v829_v44 = vmul.f32 %v3712_v22, %v828_v56  ;;  %v826_v34 = vsel %vm3745_vm13, %v3681_v24, %v822_v2 }
 0x1a1   : > { %v810_v11 = vmul.f32 0.5, %v809_v4  ;;  %v481_v42 = vpop.xlane.xlu2 %480  ;;  %v692_v27 = vmul.f32 %v638_v17, %v3210_v28  ;;  %v1002_v48 = vmul.f32 %v3661_v33, %v1001_v41  ;;  %v1074_v58 = vmul.f32 %v826_v34, %v3320_v45 }
 0x1a2   : > { %v537_v31 = vmul.f32 %v3210_v28, %v481_v42  ;;  %v1126_v38 = vmul.f32 %v3458_v51, %v1090_v39  ;;  %v830_v30 = vmul.f32 0.5, %v829_v44 }
 0x1a3   : > { %v811_v54 = vsub.f32 1.5, %v810_v11  ;;  %v724_v40 = vadd.f32 1e-05, %v692_v27  ;;  %v1110_v61 = vmul.f32 %v3458_v51, %v1074_v58  ;;  %v1006_v56 = vsel %vm3772_vm3, %v3661_v33, %v1002_v48 }
 0x1a4   : > { %v3751_v32 = vsub.f32 %v3367_v25, %v537_v31  ;;  %v2512_v10 = vpop.eup %2511  ;;  %v1146_v20 = vpack.c.bf16 %v1126_v38, %v1125_v15  ;;  %v1092_v33 = vmul.f32 %v1006_v56, %v3313_v12 }
 0x1a5   : > { %v812_v1 = vmul.f32 %v2510_v55, %v811_v54  ;;  %2513 = vrsqrt.f32 %v724_v40  ;;  %v988_v25 = vmul.f32 %v2512_v10, %v3724_v63  ;;  %vm994_vm4 = vweird.f32 %v2512_v10 }
 0x1a6   : > { %v601_v0 = vmul.f32 %v3751_v32, %v3751_v32  ;;  %vm995_vm8 = vmor %vm993_vm5, %vm994_vm4  ;;  %vm843_vm9 = vweird.f32 %v724_v40  ;;  %v1128_v36 = vmul.f32 %v3458_v51, %v1092_v33 }
 0x1a7   : > { %v816_v24 = vsel %vm815_vm2, %v2510_v55, %v812_v1  ;;  %v989_v7 = vmul.f32 %v2512_v10, %v988_v25  ;;  %649 = vadd.xlane.f32.xlu0 %v602_v57  ;;  %1310 = vmatmul.bf16.gmra.mxu2 %v1146_v20 }
 0x1a8   : > { %647 = vadd.xlane.f32.xlu2 %v601_v0  ;;  %v672_v21 = vpop.xlane.xlu1 %671  ;;  %v1073_v5 = vmul.f32 %v816_v24, %v3334_v53  ;;  %1399 = vmatmul.bf16.gmra.mxu3 %v1146_v20  ;;  %v831_v53 = vsub.f32 1.5, %v830_v30 }
 0x1a9   : > { %v674_v26 = vpop.xlane.xlu2 %673  ;;  %v709_v47 = vmul.f32 %v672_v21, %v3210_v28  ;;  %v990_v45 = vmul.f32 0.5, %v989_v7 }
 0x1aa   : > { %v710_v55 = vmul.f32 %v674_v26, %v3210_v28  ;;  %v1109_v13 = vmul.f32 %v3458_v51, %v1073_v5  ;;  %v832_v11 = vmul.f32 %v3712_v22, %v831_v53 }
 0x1ab   : > { %v2514_v62 = vpop.eup %2513  ;;  %v741_v60 = vadd.f32 1e-05, %v709_v47  ;;  %v991_v4 = vsub.f32 1.5, %v990_v45 }
 0x1ac   : > { %v838_v9 = vmul.f32 %v2514_v62, %v724_v40  ;;  %v742_v59 = vadd.f32 1e-05, %v710_v55  ;;  %v1138_v2 = vpack.c.bf16 %v1110_v61, %v1109_v13  ;;  %vm844_vm10 = vweird.f32 %v2514_v62 }
 0x1ad   : > { %2515 = vrsqrt.f32 %v741_v60  ;;  %v992_v17 = vmul.f32 %v2512_v10, %v991_v4  ;;  %vm845_vm12 = vmor %vm843_vm9, %vm844_vm10  ;;  %v836_v12 = vsel %vm835_vm11, %v3712_v22, %v832_v11  ;;  %vm1013_vm13 = vweird.f32 %v741_v60 }
 0x1ae   : > { %v839_v39 = vmul.f32 %v2514_v62, %v838_v9  ;;  %2517 = vrsqrt.f32 %v742_v59  ;;  %vm1023_vm15 = vweird.f32 %v742_v59 }
 0x1af   : > { %v996_v27 = vsel %vm995_vm8, %v2512_v10, %v992_v17  ;;  %1270 = vmatmul.bf16.gmra.mxu0 %v1138_v2 }
 0x1b0   : > { %v840_v42 = vmul.f32 0.5, %v839_v39  ;;  %1359 = vmatmul.bf16.gmra.mxu1 %v1138_v2  ;;  %v1091_v41 = vmul.f32 %v996_v27, %v3346_v16  ;;  %v1075_v16 = vmul.f32 %v836_v12, %v3331_v14 }
 0x1b2   : > { %v841_v63 = vsub.f32 1.5, %v840_v42  ;;  %v1127_v15 = vmul.f32 %v3458_v51, %v1091_v41  ;;  %v1111_v30 = vmul.f32 %v3458_v51, %v1075_v16 }
 0x1b3   : > { %v2516_v31 = vpop.eup %2515 }
 0x1b4   : > { %v2518_v38 = vpop.eup %2517  ;;  %v842_v3 = vmul.f32 %v2514_v62, %v841_v63  ;;  %v1008_v44 = vmul.f32 %v2516_v31, %v741_v60  ;;  %v1147_v40 = vpack.c.bf16 %v1128_v36, %v1127_v15  ;;  %vm1014_vm14 = vweird.f32 %v2516_v31 }
 0x1b5   : > { %v1018_v54 = vmul.f32 %v2518_v38, %v742_v59  ;;  %vm1024_vm0 = vweird.f32 %v2518_v38  ;;  %vm1015_vm1 = vmor %vm1013_vm13, %vm1014_vm14 }
 0x1b6   : > { %v1009_v57 = vmul.f32 %v2516_v31, %v1008_v44  ;;  %v846_v34 = vsel %vm845_vm12, %v2514_v62, %v842_v3  ;;  %vm1025_vm2 = vmor %vm1023_vm15, %vm1024_vm0 }
 0x1b7   : > { %v1019_v10 = vmul.f32 %v2518_v38, %v1018_v54  ;;  %v1076_v1 = vmul.f32 %v846_v34, %v3359_v6  ;;  %1315 = vmatmul.bf16.gmra.mxu2 %v1147_v40 }
 0x1b8   : > { %v1010_v20 = vmul.f32 0.5, %v1009_v57  ;;  %1404 = vmatmul.bf16.gmra.mxu3 %v1147_v40 }
 0x1b9   : > { %v1020_v25 = vmul.f32 0.5, %v1019_v10  ;;  %v1112_v0 = vmul.f32 %v3458_v51, %v1076_v1 }
 0x1ba   : > { %v1011_v22 = vsub.f32 1.5, %v1010_v20 }
 0x1bb   : > { %v1021_v48 = vsub.f32 1.5, %v1020_v25  ;;  %v1139_v58 = vpack.c.bf16 %v1112_v0, %v1111_v30 }
 0x1bc   : > { %v1012_v24 = vmul.f32 %v2516_v31, %v1011_v22 }
 0x1bd   : > { %v1022_v14 = vmul.f32 %v2518_v38, %v1021_v48 }
 0x1be   : > { %v1016_v6 = vsel %vm1015_vm1, %v2516_v31, %v1012_v24 }
 0x1bf   : > { %v1026_v7 = vsel %vm1025_vm2, %v2518_v38, %v1022_v14  ;;  %v1093_v21 = vmul.f32 %v1016_v6, %v3370_v8  ;;  %1275 = vmatmul.bf16.gmra.mxu0 %v1139_v58 }
 0x1c0   : > { %v1094_v5 = vmul.f32 %v1026_v7, %v3374_v19  ;;  %1364 = vmatmul.bf16.gmra.mxu1 %v1139_v58 }
 0x1c1   : > { %v1129_v26 = vmul.f32 %v3458_v51, %v1093_v21 }
 0x1c2   : > { %v1130_v47 = vmul.f32 %v3458_v51, %v1094_v5 }
 0x1c4   : > { %v1148_v50 = vpack.c.bf16 %v1130_v47, %v1129_v26 }
 0x1c7   : > { %1320 = vmatmul.bf16.gmra.mxu2 %v1148_v50 }
 0x1c8   : > { %1409 = vmatmul.bf16.gmra.mxu3 %v1148_v50 }
 0x1db   : > { %v642_v45 = vpop.xlane.xlu1 %641 }
 0x1dc   : > { %v694_v55 = vmul.f32 %v642_v45, %v3210_v28 }
 0x1de   : > { %v726_v13 = vadd.f32 1e-05, %v694_v55 }
 0x1e0   : > { %2519 = vrsqrt.f32 %v726_v13  ;;  %vm863_vm4 = vweird.f32 %v726_v13 }
 0x1e2   : > { %v640_v62 = vpop.xlane.xlu0 %639 }
 0x1e3   : > { %v693_v53 = vmul.f32 %v640_v62, %v3210_v28 }
 0x1e5   : > { %v725_v8 = vadd.f32 1e-05, %v693_v53 }
 0x1e6   : > { %v2520_v60 = vpop.eup %2519 }
 0x1e7   : > { %v858_v19 = vmul.f32 %v2520_v60, %v726_v13  ;;  %2521 = vrsqrt.f32 %v725_v8  ;;  %vm864_vm3 = vweird.f32 %v2520_v60  ;;  %vm853_vm7 = vweird.f32 %v725_v8 }
 0x1e8   : > { %vm865_vm5 = vmor %vm863_vm4, %vm864_vm3 }
 0x1e9   : > { %v859_v61 = vmul.f32 %v2520_v60, %v858_v19 }
 0x1ea   : > { %v678_v56 = vpop.xlane.xlu0 %677 }
 0x1eb   : > { %v860_v4 = vmul.f32 0.5, %v859_v61  ;;  %v712_v9 = vmul.f32 %v678_v56, %v3210_v28 }
 0x1ed   : > { %v2522_v59 = vpop.eup %2521  ;;  %v861_v2 = vsub.f32 1.5, %v860_v4  ;;  %v3802_v17 = vadd.f32 1e-05, %v712_v9 }
 0x1ee   : > { %v848_v39 = vmul.f32 %v2522_v59, %v725_v8  ;;  %vm854_vm6 = vweird.f32 %v2522_v59 }
 0x1ef   : > { %v862_v11 = vmul.f32 %v2520_v60, %v861_v2  ;;  %2523 = vrsqrt.f32 %v3802_v17  ;;  %vm855_vm8 = vmor %vm853_vm7, %vm854_vm6  ;;  %vm1043_vm10 = vweird.f32 %v3802_v17 }
 0x1f0   : > { %v849_v33 = vmul.f32 %v2522_v59, %v848_v39 }
 0x1f1   : > { %v866_v63 = vsel %vm865_vm5, %v2520_v60, %v862_v11 }
 0x1f2   : > { %v850_v42 = vmul.f32 0.5, %v849_v33  ;;  %v1078_v3 = vmul.f32 %v866_v63, %v3408_v49 }
 0x1f3   : > { %v644_v41 = vpop.xlane.xlu1 %643 }
 0x1f4   : > { %v851_v27 = vsub.f32 1.5, %v850_v42  ;;  %v695_v31 = vmul.f32 %v644_v41, %v3210_v28  ;;  %v1114_v10 = vmul.f32 %v3458_v51, %v1078_v3 }
 0x1f5   : > { %v3806_v36 = vpop.eup %2523 }
 0x1f6   : > { %v852_v15 = vmul.f32 %v2522_v59, %v851_v27  ;;  %v3808_v38 = vadd.f32 1e-05, %v695_v31  ;;  %v1038_v54 = vmul.f32 %v3806_v36, %v3802_v17  ;;  %vm1044_vm9 = vweird.f32 %v3806_v36 }
 0x1f7   : > { %vm3856_vm11 = vmor %vm1043_vm10, %vm1044_vm9 }
 0x1f8   : > { %v856_v44 = vsel %vm855_vm8, %v2522_v59, %v852_v15  ;;  %2525 = vrsqrt.f32 %v3808_v38  ;;  %vm873_vm14 = vweird.f32 %v3808_v38 }
 0x1f9   : > { %v1077_v12 = vmul.f32 %v856_v44, %v3425_v35  ;;  %v1039_v35 = vmul.f32 %v3806_v36, %v1038_v54 }
 0x1fa   : > { %v3815_v40 = vpop.f32.mrf.mxu2 }
 0x1fb   : > { %v1385_v57 = vpop.f32.mrf.mxu3  ;;  %v1113_v34 = vmul.f32 %v3458_v51, %v1077_v12  ;;  %v676_v16 = vpop.xlane.xlu2 %675  ;;  %v1040_v48 = vmul.f32 0.5, %v1039_v35 }
 0x1fc   : > { %v711_v1 = vmul.f32 %v676_v16, %v3210_v28  ;;  %v3820_v49 = vpop.f32.mrf.mxu0  ;;  %v1345_v20 = vpop.f32.mrf.mxu1 }
 0x1fd   : > { %v1140_v25 = vpack.c.bf16 %v1114_v10, %v1113_v34  ;;  %1489 = vrot.lane.b32.xlu1 %v3820_v49, %s2859_s10  ;;  %v1041_v26 = vsub.f32 1.5, %v1040_v48 }
 0x1fe   : > { %v3825_v0 = vpop.eup %2525  ;;  %v743_v22 = vadd.f32 1e-05, %v711_v1 }
 0x1ff   : > { %1280 = vmatmul.bf16.gmra.mxu0 %v1140_v25  ;;  %1369 = vmatmul.bf16.gmra.mxu1 %v1140_v25  ;;  %v868_v30 = vmul.f32 %v3825_v0, %v3808_v38  ;;  %v1042_v62 = vmul.f32 %v3806_v36, %v1041_v26  ;;  %vm874_vm0 = vweird.f32 %v3825_v0 }
 0x200   : > { %2527 = vrsqrt.f32 %v743_v22  ;;  %vm1033_vm13 = vweird.f32 %v743_v22  ;;  %vm3886_vm1 = vmor %vm873_vm14, %vm874_vm0 }
 0x201   : > { %v869_v47 = vmul.f32 %v3825_v0, %v868_v30  ;;  %v1046_v17 = vsel %vm3856_vm11, %v3806_v36, %v1042_v62 }
 0x202   : > { %v3830_v24 = vpop.f32.mrf.mxu2  ;;  %v1096_v63 = vmul.f32 %v1046_v17, %v3452_v23 }
 0x203   : > { %v1387_v14 = vpop.f32.mrf.mxu3  ;;  %1523 = vrot.lane.b32.xlu0 %v3830_v24, %s2859_s10  ;;  %v646_v6 = vpop.xlane.xlu2 %645  ;;  %v870_v53 = vmul.f32 0.5, %v869_v47 }
 0x204   : > { %v2246_v58 = vpack.c.bf16 %v1387_v14, %v1385_v57  ;;  %v3834_v7 = vpop.f32.mrf.mxu0  ;;  %v1347_v21 = vpop.f32.mrf.mxu1  ;;  %v696_v5 = vmul.f32 %v646_v6, %v3210_v28 }
 0x205   : > { %v2206_v50 = vpack.c.bf16 %v1347_v21, %v1345_v20  ;;  %1521 = vrot.lane.b32.xlu1 %v3815_v40, %s2859_s10  ;;  %1491 = vrot.lane.b32.xlu2 %v3834_v7, %s2859_s10  ;;  %v871_v39 = vsub.f32 1.5, %v870_v53 }
 0x206   : > { %2305 = vst [vmem:[%s3840_s12 + $0x40] sm:$0xff] %v2246_v58   ;;  %v2528_v45 = vpop.eup %2527  ;;  %v3847_v55 = vadd.f32 1e-05, %v696_v5 }
 0x207   : > { %v1028_v13 = vmul.f32 %v2528_v45, %v743_v22  ;;  %2207 = vst [vmem:[%s3840_s12] sm:$0xff] %v2206_v50   ;;  %vm1034_vm12 = vweird.f32 %v2528_v45  ;;  %v872_v31 = vmul.f32 %v3825_v0, %v871_v39 }
 0x208   : > { %2529 = vrsqrt.f32 %v3847_v55  ;;  %vm1035_vm15 = vmor %vm1033_vm13, %vm1034_vm12  ;;  %vm883_vm3 = vweird.f32 %v3847_v55 }
 0x209   : > { %v1029_v8 = vmul.f32 %v2528_v45, %v1028_v13  ;;  %v876_v38 = vsel %vm3886_vm1, %v3825_v0, %v872_v31 }
 0x20a   : > { %v3853_v60 = vpop.f32.mrf.mxu2  ;;  %v1079_v6 = vmul.f32 %v876_v38, %v3526_v18  ;;  %v2539_v38 = vld [vmem:[#allocation5] ss:$0 sm:$0xff] }
 0x20b   : > { %v1390_v19 = vpop.f32.mrf.mxu3  ;;  %v1030_v61 = vmul.f32 0.5, %v1029_v8  ;;  %v682_v56 = vpop.xlane.xlu1 %681 }
 0x20c   : > { %v3860_v9 = vpop.f32.mrf.mxu0  ;;  %v1350_v59 = vpop.f32.mrf.mxu1  ;;  %v714_v2 = vmul.f32 %v682_v56, %v3210_v28  ;;  %v1115_v56 = vmul.f32 %v3458_v51, %v1079_v6 }
 0x20d   : > { %v1031_v11 = vsub.f32 1.5, %v1030_v61  ;;  %1525 = vrot.lane.b32.xlu2 %v3853_v60, %s2859_s10  ;;  %1493 = vrot.lane.b32.xlu0 %v3860_v9, %s2859_s10 }
 0x20e   : > { %v2530_v33 = vpop.eup %2529  ;;  %v3870_v42 = vadd.f32 1e-05, %v714_v2 }
 0x20f   : > { %v1032_v27 = vmul.f32 %v2528_v45, %v1031_v11  ;;  %v878_v41 = vmul.f32 %v2530_v33, %v3847_v55  ;;  %vm884_vm2 = vweird.f32 %v2530_v33 }
 0x210   : > { %2531 = vrsqrt.f32 %v3870_v42  ;;  %vm885_vm4 = vmor %vm883_vm3, %vm884_vm2  ;;  %vm1063_vm6 = vweird.f32 %v3870_v42 }
 0x211   : > { %v879_v15 = vmul.f32 %v2530_v33, %v878_v41  ;;  %v1036_v3 = vsel %vm1035_vm15, %v2528_v45, %v1032_v27 }
 0x212   : > { %v680_v36 = vpop.xlane.xlu0 %679  ;;  %v3878_v44 = vpop.f32.mrf.mxu2  ;;  %v1095_v57 = vmul.f32 %v1036_v3, %v3578_v29  ;;  %v1132_v29 = vmul.f32 %v3458_v51, %v1096_v63 }
 0x213   : > { %v1392_v12 = vpop.f32.mrf.mxu3  ;;  %v713_v54 = vmul.f32 %v680_v36, %v3210_v28  ;;  %v880_v34 = vmul.f32 0.5, %v879_v15  ;;  %1527 = vrot.lane.b32.xlu1 %v3878_v44, %s2859_s10 }
 0x214   : > { %v2251_v10 = vpack.c.bf16 %v1392_v12, %v1390_v19  ;;  %v3890_v16 = vpop.f32.mrf.mxu0  ;;  %v1352_v1 = vpop.f32.mrf.mxu1  ;;  %v1131_v25 = vmul.f32 %v3458_v51, %v1095_v57 }
 0x215   : > { %v3892_v20 = vadd.f32 1e-05, %v713_v54  ;;  %v881_v35 = vsub.f32 1.5, %v880_v34  ;;  %v2211_v22 = vpack.c.bf16 %v1352_v1, %v1350_v59  ;;  %1495 = vrot.lane.b32.xlu2 %v3890_v16, %s2859_s10 }
 0x216   : > { %2306 = vst [vmem:[%s3840_s12 + $0x48] sm:$0xff] %v2251_v10   ;;  %v3902_v48 = vpop.eup %2531  ;;  %v1149_v30 = vpack.c.bf16 %v1132_v29, %v1131_v25 }
 0x217   : > { %2533 = vrsqrt.f32 %v3892_v20  ;;  %v882_v14 = vmul.f32 %v2530_v33, %v881_v35  ;;  %v1058_v58 = vmul.f32 %v3902_v48, %v3870_v42  ;;  %2298 = vst [vmem:[%s3840_s12 + $0x8] sm:$0xff] %v2211_v22   ;;  %vm1064_vm5 = vweird.f32 %v3902_v48 }
 0x218   : > { %1325 = vmatmul.bf16.gmra.mxu2 %v1149_v30  ;;  %1414 = vmatmul.bf16.gmra.mxu3 %v1149_v30  ;;  %vm3931_vm7 = vmor %vm1063_vm6, %vm1064_vm5  ;;  %vm1053_vm9 = vweird.f32 %v3892_v20 }
 0x219   : > { %v1059_v21 = vmul.f32 %v3902_v48, %v1058_v58  ;;  %v886_v26 = vsel %vm885_vm4, %v2530_v33, %v882_v14 }
 0x21a   : > { %v650_v5 = vpop.xlane.xlu0 %649  ;;  %v3911_v47 = vpop.f32.mrf.mxu2  ;;  %v1080_v13 = vmul.f32 %v886_v26, %v3625_v46 }
 0x21b   : > { %v648_v0 = vpop.xlane.xlu2 %647  ;;  %v1395_v50 = vpop.f32.mrf.mxu3  ;;  %v698_v55 = vmul.f32 %v650_v5, %v3210_v28  ;;  %v1060_v62 = vmul.f32 0.5, %v1059_v21  ;;  %1529 = vrot.lane.b32.xlu0 %v3911_v47, %s2859_s10 }
 0x21c   : > { %v697_v45 = vmul.f32 %v648_v0, %v3210_v28  ;;  %v3918_v18 = vpop.f32.mrf.mxu0  ;;  %v1116_v4 = vmul.f32 %v3458_v51, %v1080_v13 }
 0x21d   : > { %v2534_v53 = vpop.eup %2533  ;;  %v1355_v8 = vpop.f32.mrf.mxu1  ;;  %v3920_v61 = vadd.f32 1e-05, %v698_v55  ;;  %v1061_v59 = vsub.f32 1.5, %v1060_v62  ;;  %1497 = vrot.lane.b32.xlu1 %v3918_v18, %s2859_s10 }
 0x21e   : > { %v729_v19 = vadd.f32 1e-05, %v697_v45  ;;  %v1048_v28 = vmul.f32 %v2534_v53, %v3892_v20  ;;  %v1141_v46 = vpack.c.bf16 %v1116_v4, %v1115_v56  ;;  %vm1054_vm8 = vweird.f32 %v2534_v53 }
 0x21f   : > { %v1062_v2 = vmul.f32 %v3902_v48, %v1061_v59  ;;  %vm1055_vm10 = vmor %vm1053_vm9, %vm1054_vm8  ;;  %vm903_vm15 = vweird.f32 %v3920_v61 }
 0x220   : > { %2535 = vrsqrt.f32 %v729_v19  ;;  %v1049_v39 = vmul.f32 %v2534_v53, %v1048_v28  ;;  %1285 = vmatmul.bf16.gmra.mxu0 %v1141_v46  ;;  %1374 = vmatmul.bf16.gmra.mxu1 %v1141_v46  ;;  %vm893_vm13 = vweird.f32 %v729_v19 }
 0x221   : > { %2537 = vrsqrt.f32 %v3920_v61  ;;  %v1066_v63 = vsel %vm3931_vm7, %v3902_v48, %v1062_v2 }
 0x222   : > { %v1050_v51 = vmul.f32 0.5, %v1049_v39  ;;  %v3935_v17 = vpop.f32.mrf.mxu2  ;;  %v1098_v34 = vmul.f32 %v1066_v63, %v3678_v37 }
 0x223   : > { %v1397_v33 = vpop.f32.mrf.mxu3  ;;  %1531 = vrot.lane.b32.xlu2 %v3935_v17, %s2859_s10 }
 0x224   : > { %v1051_v27 = vsub.f32 1.5, %v1050_v51  ;;  %v2256_v41 = vpack.c.bf16 %v1397_v33, %v1395_v50  ;;  %v3942_v31 = vpop.f32.mrf.mxu0  ;;  %v1134_v30 = vmul.f32 %v2539_v38, %v1098_v34 }
 0x225   : > { %v1357_v15 = vpop.f32.mrf.mxu1  ;;  %1499 = vrot.lane.b32.xlu0 %v3942_v31, %s2859_s10 }
 0x226   : > { %v2536_v42 = vpop.eup %2535  ;;  %v1052_v3 = vmul.f32 %v2534_v53, %v1051_v27  ;;  %2307 = vst [vmem:[%s3840_s12 + $0x50] sm:$0xff] %v2256_v41   ;;  %v2216_v57 = vpack.c.bf16 %v1357_v15, %v1355_v8 }
 0x227   : > { %v2538_v36 = vpop.eup %2537  ;;  %v888_v12 = vmul.f32 %v2536_v42, %v729_v19  ;;  %vm894_vm11 = vweird.f32 %v2536_v42 }
 0x228   : > { %v898_v54 = vmul.f32 %v2538_v36, %v3920_v61  ;;  %v1056_v23 = vsel %vm1055_vm10, %v2534_v53, %v1052_v3  ;;  %2299 = vst [vmem:[%s3840_s12 + $0x10] sm:$0xff] %v2216_v57   ;;  %vm904_vm12 = vweird.f32 %v2538_v36  ;;  %vm895_vm14 = vmor %vm893_vm13, %vm894_vm11  ;;  %v1554_v3 = vld [vmem:[%s4001_s19 + $0x8] sm:$0xff]  ;;  %v1553_v57 = vld [vmem:[%s4001_s19] sm:$0xff] }
 0x229   : > { %v889_v10 = vmul.f32 %v2536_v42, %v888_v12  ;;  %v1097_v25 = vmul.f32 %v1056_v23, %v3715_v43  ;;  %vm905_vm0 = vmor %vm903_vm15, %vm904_vm12  ;;  %v1425_v12 = vld [vmem:[%s3128_s27] sm:$0xff] }
 0x22a   : > { %v899_v1 = vmul.f32 %v2538_v36, %v898_v54  ;;  %v3952_v20 = vpop.f32.mrf.mxu2  ;;  %v1426_v54 = vld [vmem:[%s3128_s27 + $0x8] sm:$0xff]  ;;  %v1457_v23 = vmul.f32 %v1425_v12, %v3820_v49 }
 0x22b   : > { %v890_v29 = vmul.f32 0.5, %v889_v10  ;;  %v1400_v22 = vpop.f32.mrf.mxu3  ;;  %v1133_v48 = vmul.f32 %v2539_v38, %v1097_v25  ;;  %1533 = vrot.lane.b32.xlu1 %v3952_v20, %s2859_s10 }
 0x22c   : > { %v900_v35 = vmul.f32 0.5, %v899_v1  ;;  %v3956_v58 = vpop.f32.mrf.mxu0  ;;  %v1458_v1 = vmul.f32 %v1426_v54, %v3834_v7 }
 0x22d   : > { %v891_v14 = vsub.f32 1.5, %v890_v29  ;;  %v1360_v6 = vpop.f32.mrf.mxu1  ;;  %v1150_v21 = vpack.c.bf16 %v1134_v30, %v1133_v48  ;;  %1501 = vrot.lane.b32.xlu2 %v3956_v58, %s2859_s10  ;;  %v1441_v30 = vld [vmem:[%s3128_s27 + $0x80] sm:$0xff] }
 0x22e   : > { %v901_v37 = vsub.f32 1.5, %v900_v35 }
 0x22f   : > { %v892_v43 = vmul.f32 %v2536_v42, %v891_v14  ;;  %1330 = vmatmul.bf16.gmra.mxu2 %v1150_v21  ;;  %1419 = vmatmul.bf16.gmra.mxu3 %v1150_v21  ;;  %v1442_v14 = vld [vmem:[%s3128_s27 + $0x88] sm:$0xff]  ;;  %v1473_v21 = vmul.f32 %v1441_v30, %v3815_v40  ;;  %v1428_v40 = vld [vmem:[%s3128_s27 + $0x18] sm:$0xff] }
 0x230   : > { %v902_v0 = vmul.f32 %v2538_v36, %v901_v37 }
 0x231   : > { %v896_v5 = vsel %vm895_vm14, %v2536_v42, %v892_v43  ;;  %v1474_v43 = vmul.f32 %v1442_v14, %v3830_v24 }
 0x232   : > { %v906_v26 = vsel %vm905_vm0, %v2538_v36, %v902_v0  ;;  %v1081_v50 = vmul.f32 %v896_v5, %v3751_v32  ;;  %v3963_v55 = vpop.f32.mrf.mxu2 }
 0x233   : > { %v1082_v45 = vmul.f32 %v906_v26, %v3735_v52  ;;  %v1402_v13 = vpop.f32.mrf.mxu3  ;;  %1535 = vrot.lane.b32.xlu0 %v3963_v55, %s2859_s10 }
 0x234   : > { %v1117_v62 = vmul.f32 %v2539_v38, %v1081_v50  ;;  %v2261_v53 = vpack.c.bf16 %v1402_v13, %v1400_v22  ;;  %v3967_v19 = vpop.f32.mrf.mxu0 }
 0x235   : > { %v1118_v8 = vmul.f32 %v2539_v38, %v1082_v45  ;;  %v1362_v61 = vpop.f32.mrf.mxu1  ;;  %1503 = vrot.lane.b32.xlu1 %v3967_v19, %s2859_s10  ;;  %v1570_v38 = vld [vmem:[%s4001_s19 + $0x88] sm:$0xff]  ;;  %v1556_v45 = vld [vmem:[%s4001_s19 + $0x18] sm:$0xff] }
 0x236   : > { %2308 = vst [vmem:[%s3840_s12 + $0x58] sm:$0xff] %v2261_v53   ;;  %v2221_v56 = vpack.c.bf16 %v1362_v61, %v1360_v6  ;;  %v1569_v6 = vld [vmem:[%s4001_s19 + $0x80] sm:$0xff]  ;;  %v1555_v61 = vld [vmem:[%s4001_s19 + $0x10] sm:$0xff] }
 0x237   : > { %v1142_v32 = vpack.c.bf16 %v1118_v8, %v1117_v62  ;;  %v1427_v8 = vld [vmem:[%s3128_s27 + $0x10] sm:$0xff] }
 0x238   : > { %2300 = vst [vmem:[%s3840_s12 + $0x18] sm:$0xff] %v2221_v56  }
 0x239   : > { %1290 = vmatmul.bf16.gmra.mxu0 %v1142_v32  ;;  %1379 = vmatmul.bf16.gmra.mxu1 %v1142_v32  ;;  %v1459_v32 = vmul.f32 %v1427_v8, %v3860_v9 }
 0x23a   : > { %v3973_v52 = vpop.f32.mrf.mxu2 }
 0x23b   : > { %v1405_v4 = vpop.f32.mrf.mxu3  ;;  %1537 = vrot.lane.b32.xlu2 %v3973_v52, %s2859_s10 }
 0x23c   : > { %v3977_v59 = vpop.f32.mrf.mxu0 }
 0x23d   : > { %v1365_v28 = vpop.f32.mrf.mxu1  ;;  %1505 = vrot.lane.b32.xlu0 %v3977_v59, %s2859_s10 }
 0x242   : > { %v3981_v46 = vpop.f32.mrf.mxu2 }
 0x243   : > { %v1407_v2 = vpop.f32.mrf.mxu3  ;;  %1539 = vrot.lane.b32.xlu1 %v3981_v46, %s2859_s10 }
 0x244   : > { %v2266_v39 = vpack.c.bf16 %v1407_v2, %v1405_v4  ;;  %v3985_v51 = vpop.f32.mrf.mxu0  ;;  %v1460_v4 = vmul.f32 %v1428_v40, %v3890_v16  ;;  %v1571_v2 = vld [vmem:[%s4001_s19 + $0x90] sm:$0xff] }
 0x245   : > { %v1367_v11 = vpop.f32.mrf.mxu1  ;;  %1507 = vrot.lane.b32.xlu2 %v3985_v51, %s2859_s10 }
 0x246   : > { %2309 = vst [vmem:[%s3840_s12 + $0x60] sm:$0xff] %v2266_v39   ;;  %v2226_v33 = vpack.c.bf16 %v1367_v11, %v1365_v28 }
 0x248   : > { %2301 = vst [vmem:[%s3840_s12 + $0x20] sm:$0xff] %v2226_v33   ;;  %v1443_v33 = vld [vmem:[%s3128_s27 + $0x90] sm:$0xff] }
 0x249   : > { %v1475_v54 = vmul.f32 %v1443_v33, %v3853_v60  ;;  %v1576_v33 = vld [vmem:[%s4001_s19 + $0xb8] sm:$0xff] }
 0x24a   : > { %v3991_v27 = vpop.f32.mrf.mxu2 }
 0x24b   : > { %v1410_v41 = vpop.f32.mrf.mxu3  ;;  %1541 = vrot.lane.b32.xlu0 %v3991_v27, %s2859_s10 }
 0x252   : > { %v3995_v63 = vpop.f32.mrf.mxu2 }
 0x253   : > { %v1412_v42 = vpop.f32.mrf.mxu3  ;;  %1543 = vrot.lane.b32.xlu2 %v3995_v63, %s2859_s10 }
 0x254   : > { %v2271_v15 = vpack.c.bf16 %v1412_v42, %v1410_v41  ;;  %v1444_v41 = vld [vmem:[%s3128_s27 + $0x98] sm:$0xff] }
 0x255   : > { %v1572_v42 = vld [vmem:[%s4001_s19 + $0x98] sm:$0xff] }
 0x256   : > { %2310 = vst [vmem:[%s3840_s12 + $0x68] sm:$0xff] %v2271_v15  }
 0x25f   : > { %v1492_v36 = vpop.permute.xlu2 %1491 }
 0x260   : > { %v1586_v34 = vmul.f32 %v1554_v3, %v1492_v36 }
 0x262   : > { %v1618_v35 = vadd.f32 %v1586_v34, %v1458_v1  ;;  %v1574_v1 = vld [vmem:[%s4001_s19 + $0xa8] sm:$0xff] }
 0x267   : > { %v1526_v25 = vpop.permute.xlu2 %1525 }
 0x268   : > { %v1603_v3 = vmul.f32 %v1571_v2, %v1526_v25  ;;  %v1559_v2 = vld [vmem:[%s4001_s19 + $0x30] sm:$0xff] }
 0x26f   : > { %v1490_v10 = vpop.permute.xlu1 %1489  ;;  %v1496_v5 = vpop.permute.xlu2 %1495 }
 0x270   : > { %v1585_v29 = vmul.f32 %v1553_v57, %v1490_v10  ;;  %v1588_v24 = vmul.f32 %v1556_v45, %v1496_v5  ;;  %v1476_v57 = vmul.f32 %v1444_v41, %v3878_v44  ;;  %v1635_v10 = vadd.f32 %v1603_v3, %v1475_v54  ;;  %v1558_v5 = vld [vmem:[%s4001_s19 + $0x28] sm:$0xff]  ;;  %v1431_v41 = vld [vmem:[%s3128_s27 + $0x30] sm:$0xff]  ;;  %v1560_v54 = vld [vmem:[%s4001_s19 + $0x38] sm:$0xff] }
 0x272   : > { %v1617_v22 = vadd.f32 %v1585_v29, %v1457_v23  ;;  %v1620_v39 = vadd.f32 %v1588_v24, %v1460_v4  ;;  %v1447_v4 = vld [vmem:[%s3128_s27 + $0xb0] sm:$0xff] }
 0x273   : > { %v1479_v3 = vmul.f32 %v1447_v4, %v3952_v20 }
 0x274   : > { %v2126_v48 = vpack.c.bf16 %v1618_v35, %v1617_v22  ;;  %v1445_v35 = vld [vmem:[%s3128_s27 + $0xa0] sm:$0xff]  ;;  %v1446_v22 = vld [vmem:[%s3128_s27 + $0xa8] sm:$0xff] }
 0x275   : > { %v1524_v37 = vpop.permute.xlu0 %1523  ;;  %v1477_v44 = vmul.f32 %v1445_v35, %v3911_v47  ;;  %v1478_v30 = vmul.f32 %v1446_v22, %v3935_v17 }
 0x276   : > { %2127 = vst [vmem:[%s4015_s3] sm:$0xff] %v2126_v48   ;;  %v1602_v49 = vmul.f32 %v1570_v38, %v1524_v37  ;;  %v1573_v38 = vld [vmem:[%s4001_s19 + $0xa0] sm:$0xff] }
 0x277   : > { %v1522_v7 = vpop.permute.xlu1 %1521 }
 0x278   : > { %v1601_v0 = vmul.f32 %v1569_v6, %v1522_v7  ;;  %v1634_v26 = vadd.f32 %v1602_v49, %v1474_v43  ;;  %v1557_v7 = vld [vmem:[%s4001_s19 + $0x20] sm:$0xff] }
 0x279   : > { %v1429_v43 = vld [vmem:[%s3128_s27 + $0x20] sm:$0xff] }
 0x27a   : > { %v1633_v50 = vadd.f32 %v1601_v0, %v1473_v21  ;;  %v1430_v0 = vld [vmem:[%s3128_s27 + $0x28] sm:$0xff]  ;;  %v1461_v45 = vmul.f32 %v1429_v43, %v3918_v18 }
 0x27b   : > { %v1462_v47 = vmul.f32 %v1430_v0, %v3942_v31 }
 0x27c   : > { %v4021_v13 = vpop.f32.mrf.mxu0  ;;  %v1370_v62 = vpop.f32.mrf.mxu1  ;;  %v2166_v53 = vpack.c.bf16 %v1634_v26, %v1633_v50 }
 0x27d   : > { %1509 = vrot.lane.b32.xlu1 %v4021_v13, %s2859_s10  ;;  %v1532_v25 = vpop.permute.xlu2 %1531 }
 0x27e   : > { %2290 = vst [vmem:[%s4015_s3 + $0x40] sm:$0xff] %v2166_v53   ;;  %v1606_v48 = vmul.f32 %v1574_v1, %v1532_v25  ;;  %v1463_v1 = vmul.f32 %v1431_v41, %v3956_v58  ;;  %v1451_v41 = vld [vmem:[%s3128_s27 + $0xd0] sm:$0xff] }
 0x27f   : > { %v1494_v56 = vpop.permute.xlu0 %1493 }
 0x280   : > { %v1587_v28 = vmul.f32 %v1555_v61, %v1494_v56  ;;  %v1638_v37 = vadd.f32 %v1606_v48, %v1478_v30  ;;  %v1562_v30 = vld [vmem:[%s4001_s19 + $0x48] sm:$0xff] }
 0x282   : > { %v1619_v11 = vadd.f32 %v1587_v28, %v1459_v32  ;;  %v1575_v32 = vld [vmem:[%s4001_s19 + $0xb0] sm:$0xff]  ;;  %v1448_v28 = vld [vmem:[%s3128_s27 + $0xb8] sm:$0xff] }
 0x284   : > { %v4035_v15 = vpop.f32.mrf.mxu0  ;;  %v1372_v36 = vpop.f32.mrf.mxu1  ;;  %v2131_v12 = vpack.c.bf16 %v1620_v39, %v1619_v11 }
 0x285   : > { %v2231_v9 = vpack.c.bf16 %v1372_v36, %v1370_v62  ;;  %1511 = vrot.lane.b32.xlu0 %v4035_v15, %s2859_s10  ;;  %v1528_v16 = vpop.permute.xlu1 %1527 }
 0x286   : > { %2283 = vst [vmem:[%s4015_s3 + $0x8] sm:$0xff] %v2131_v12   ;;  %v1604_v34 = vmul.f32 %v1572_v42, %v1528_v16  ;;  %v1432_v12 = vld [vmem:[%s3128_s27 + $0x38] sm:$0xff] }
 0x287   : > { %2302 = vst [vmem:[%s3840_s12 + $0x28] sm:$0xff] %v2231_v9   ;;  %v1502_v62 = vpop.permute.xlu2 %1501 }
 0x288   : > { %v1636_v23 = vadd.f32 %v1604_v34, %v1476_v57  ;;  %v1480_v57 = vmul.f32 %v1448_v28, %v3963_v55  ;;  %v1591_v34 = vmul.f32 %v1559_v2, %v1502_v62  ;;  %v1450_v62 = vld [vmem:[%s3128_s27 + $0xc8] sm:$0xff] }
 0x28a   : > { %v2171_v29 = vpack.c.bf16 %v1636_v23, %v1635_v10  ;;  %v1623_v48 = vadd.f32 %v1591_v34, %v1463_v1  ;;  %v1483_v34 = vmul.f32 %v1451_v41, %v3991_v27 }
 0x28c   : > { %2291 = vst [vmem:[%s4015_s3 + $0x48] sm:$0xff] %v2171_v29   ;;  %v1464_v29 = vmul.f32 %v1432_v12, %v3967_v19  ;;  %v1434_v19 = vld [vmem:[%s3128_s27 + $0x48] sm:$0xff] }
 0x28d   : > { %v1530_v60 = vpop.permute.xlu0 %1529  ;;  %v1466_v43 = vmul.f32 %v1434_v19, %v3985_v51 }
 0x28e   : > { %v1605_v14 = vmul.f32 %v1573_v38, %v1530_v60 }
 0x28f   : > { %v1498_v21 = vpop.permute.xlu1 %1497 }
 0x290   : > { %v1637_v6 = vadd.f32 %v1605_v14, %v1477_v44  ;;  %v1589_v26 = vmul.f32 %v1557_v7, %v1498_v21 }
 0x292   : > { %v2176_v49 = vpack.c.bf16 %v1638_v37, %v1637_v6  ;;  %v1621_v53 = vadd.f32 %v1589_v26, %v1461_v45  ;;  %v1433_v37 = vld [vmem:[%s3128_s27 + $0x40] sm:$0xff] }
 0x293   : > { %v1561_v6 = vld [vmem:[%s4001_s19 + $0x40] sm:$0xff]  ;;  %v1465_v21 = vmul.f32 %v1433_v37, %v3977_v59 }
 0x294   : > { %2292 = vst [vmem:[%s4015_s3 + $0x50] sm:$0xff] %v2176_v49  }
 0x295   : > { %v1538_v39 = vpop.permute.xlu2 %1537 }
 0x297   : > { %v1500_v50 = vpop.permute.xlu0 %1499 }
 0x298   : > { %v1590_v17 = vmul.f32 %v1558_v5, %v1500_v50  ;;  %v1577_v5 = vld [vmem:[%s4001_s19 + $0xc0] sm:$0xff] }
 0x29a   : > { %v1622_v8 = vadd.f32 %v1590_v17, %v1462_v47  ;;  %v1449_v17 = vld [vmem:[%s3128_s27 + $0xc0] sm:$0xff] }
 0x29b   : > { %v4057_v40 = vpop.f32.mrf.mxu2  ;;  %v1415_v61 = vpop.f32.mrf.mxu3 }
 0x29c   : > { %v2136_v24 = vpack.c.bf16 %v1622_v8, %v1621_v53  ;;  %1545 = vrot.lane.b32.xlu1 %v4057_v40, %s2859_s10  ;;  %v1578_v53 = vld [vmem:[%s4001_s19 + $0xc8] sm:$0xff]  ;;  %v1609_v8 = vmul.f32 %v1577_v5, %v1538_v39  ;;  %v1580_v39 = vld [vmem:[%s4001_s19 + $0xd8] sm:$0xff] }
 0x29d   : > { %v4061_v56 = vpop.f32.mrf.mxu0  ;;  %v1375_v18 = vpop.f32.mrf.mxu1 }
 0x29e   : > { %2284 = vst [vmem:[%s4015_s3 + $0x10] sm:$0xff] %v2136_v24   ;;  %1513 = vrot.lane.b32.xlu2 %v4061_v56, %s2859_s10  ;;  %v1534_v31 = vpop.permute.xlu1 %1533 }
 0x29f   : > { %v1607_v42 = vmul.f32 %v1575_v32, %v1534_v31  ;;  %v1508_v58 = vpop.permute.xlu2 %1507  ;;  %v1482_v31 = vmul.f32 %v1450_v62, %v3981_v46 }
 0x2a0   : > { %v1594_v49 = vmul.f32 %v1562_v30, %v1508_v58 }
 0x2a1   : > { %v1639_v35 = vadd.f32 %v1607_v42, %v1479_v3  ;;  %v1452_v42 = vld [vmem:[%s3128_s27 + $0xd8] sm:$0xff] }
 0x2a2   : > { %v1626_v45 = vadd.f32 %v1594_v49, %v1466_v43 }
 0x2a3   : > { %v1417_v11 = vpop.f32.mrf.mxu3  ;;  %v4083_v38 = vpop.f32.mrf.mxu2 }
 0x2a4   : > { %v2276_v36 = vpack.c.bf16 %v1417_v11, %v1415_v61 }
 0x2a5   : > { %v1536_v9 = vpop.permute.xlu0 %1535  ;;  %v4074_v16 = vpop.f32.mrf.mxu0 }
 0x2a6   : > { %2311 = vst [vmem:[%s3840_s12 + $0x70] sm:$0xff] %v2276_v36   ;;  %v1608_v10 = vmul.f32 %v1576_v33, %v1536_v9  ;;  %v1377_v23 = vpop.f32.mrf.mxu1  ;;  %1515 = vrot.lane.b32.xlu1 %v4074_v16, %s2859_s10  ;;  %v1579_v36 = vld [vmem:[%s4001_s19 + $0xd0] sm:$0xff] }
 0x2a7   : > { %v2236_v20 = vpack.c.bf16 %v1377_v23, %v1375_v18  ;;  %v1504_v25 = vpop.permute.xlu1 %1503  ;;  %v1481_v18 = vmul.f32 %v1449_v17, %v3973_v52 }
 0x2a8   : > { %v1640_v55 = vadd.f32 %v1608_v10, %v1480_v57  ;;  %v1592_v22 = vmul.f32 %v1560_v54, %v1504_v25  ;;  %v1484_v10 = vmul.f32 %v1452_v42, %v3995_v63 }
 0x2a9   : > { %2303 = vst [vmem:[%s3840_s12 + $0x30] sm:$0xff] %v2236_v20   ;;  %v1641_v4 = vadd.f32 %v1609_v8, %v1481_v18 }
 0x2aa   : > { %v2181_v60 = vpack.c.bf16 %v1640_v55, %v1639_v35  ;;  %v1624_v44 = vadd.f32 %v1592_v22, %v1464_v29 }
 0x2ac   : > { %2293 = vst [vmem:[%s4015_s3 + $0x58] sm:$0xff] %v2181_v60   ;;  %v2141_v14 = vpack.c.bf16 %v1624_v44, %v1623_v48 }
 0x2ad   : > { %v1544_v28 = vpop.permute.xlu2 %1543 }
 0x2ae   : > { %2285 = vst [vmem:[%s4015_s3 + $0x18] sm:$0xff] %v2141_v14   ;;  %v1612_v3 = vmul.f32 %v1580_v39, %v1544_v28 }
 0x2af   : > { %v1506_v7 = vpop.permute.xlu0 %1505 }
 0x2b0   : > { %v1593_v0 = vmul.f32 %v1561_v6, %v1506_v7  ;;  %v1644_v1 = vadd.f32 %v1612_v3, %v1484_v10 }
 0x2b2   : > { %v4095_v26 = vpop.f32.mrf.mxu2  ;;  %v1420_v50 = vpop.f32.mrf.mxu3  ;;  %v1625_v47 = vadd.f32 %v1593_v0, %v1465_v21 }
 0x2b4   : > { %v2146_v61 = vpack.c.bf16 %v1626_v45, %v1625_v47 }
 0x2b5   : > { %v1540_v51 = vpop.permute.xlu1 %1539 }
 0x2b6   : > { %v4100_v24 = vpop.f32.mrf.mxu0  ;;  %v1380_v59 = vpop.f32.mrf.mxu1  ;;  %2286 = vst [vmem:[%s4015_s3 + $0x20] sm:$0xff] %v2146_v61   ;;  %v1610_v32 = vmul.f32 %v1578_v53, %v1540_v51 }
 0x2b7   : > { %1517 = vrot.lane.b32.xlu0 %v4100_v24, %s2859_s10 }
 0x2b8   : > { %v1642_v2 = vadd.f32 %v1610_v32, %v1482_v31 }
 0x2ba   : > { %v4112_v52 = vpop.f32.mrf.mxu2  ;;  %v1422_v46 = vpop.f32.mrf.mxu3  ;;  %v2186_v11 = vpack.c.bf16 %v1642_v2, %v1641_v4 }
 0x2bb   : > { %v2281_v33 = vpack.c.bf16 %v1422_v46, %v1420_v50  ;;  %1551 = vrot.lane.b32.xlu1 %v4112_v52, %s2859_s10 }
 0x2bc   : > { %2294 = vst [vmem:[%s4015_s3 + $0x60] sm:$0xff] %v2186_v11  }
 0x2bd   : > { %2312 = vst [vmem:[%s3840_s12 + $0x78] sm:$0xff] %v2281_v33   ;;  %v1542_v54 = vpop.permute.xlu0 %1541 }
 0x2be   : > { %v4126_v12 = vpop.f32.mrf.mxu0  ;;  %v1382_v9 = vpop.f32.mrf.mxu1  ;;  %v1611_v23 = vmul.f32 %v1579_v36, %v1542_v54 }
 0x2bf   : > { %v2241_v57 = vpack.c.bf16 %v1382_v9, %v1380_v59  ;;  %1547 = vrot.lane.b32.xlu0 %v4083_v38, %s2859_s10  ;;  %1519 = vrot.lane.b32.xlu2 %v4126_v12, %s2859_s10 }
 0x2c0   : > { %v1643_v20 = vadd.f32 %v1611_v23, %v1483_v34 }
 0x2c1   : > { %2304 = vst [vmem:[%s3840_s12 + $0x38] sm:$0xff] %v2241_v57  }
 0x2c2   : > { %2717 = shalt.err (!%p2714_p2)
}
 0x2c3   : > { %s2860_s12 = smov 4   ;;  %v2191_v27 = vpack.c.bf16 %v1644_v1, %v1643_v20  ;;  %v1563_v63 = vld [vmem:[%s4001_s19 + $0x50] sm:$0xff]  ;;  %v1436_v35 = vld [vmem:[%s3128_s27 + $0x58] sm:$0xff]  ;;  %v1565_v6 = vld [vmem:[%s4001_s19 + $0x60] sm:$0xff]  ;;  %s4342_s8 = sld [smem:[#allocation34_spill]] }
 0x2c4   : > { %2344 = dma.vmem_to_hbm [thread:$0]  (%p3074_p1), %s1817_s16, 2048, %s1819_s5, %s1783_s24, %s2859_s10, %s2859_s10, %s2860_s12   ;;  %v1468_v44 = vmul.f32 %v1436_v35, %v4035_v15 }
 0x2c5   : > { %2295 = vst [vmem:[%s4015_s3 + $0x68] sm:$0xff] %v2191_v27   ;;  %v1435_v29 = vld [vmem:[%s3128_s27 + $0x50] sm:$0xff]  ;;  %v1564_v55 = vld [vmem:[%s4001_s19 + $0x58] sm:$0xff]  ;;  %v1437_v7 = vld [vmem:[%s3128_s27 + $0x60] sm:$0xff]  ;;  %s1778_s15 = scalar_lea.sflag [#allocation4], %s3109_s22 }
 0x2c6   : > { %v1467_v60 = vmul.f32 %v1435_v29, %v4021_v13  ;;  %v1438_v21 = vld [vmem:[%s3128_s27 + $0x68] sm:$0xff]  ;;  %v1469_v15 = vmul.f32 %v1437_v7, %v4061_v56  ;;  %v1568_v53 = vld [vmem:[%s4001_s19 + $0x78] sm:$0xff]  ;;  %v1439_v8 = vld [vmem:[%s3128_s27 + $0x70] sm:$0xff] }
 0x2c7   : > { %1549 = vrot.lane.b32.xlu2 %v4095_v26, %s2859_s10  ;;  %v1566_v43 = vld [vmem:[%s4001_s19 + $0x68] sm:$0xff]  ;;  %v1470_v5 = vmul.f32 %v1438_v21, %v4074_v16  ;;  %v1440_v61 = vld [vmem:[%s3128_s27 + $0x78] sm:$0xff]  ;;  %v1567_v59 = vld [vmem:[%s4001_s19 + $0x70] sm:$0xff]  ;;  %v1471_v16 = vmul.f32 %v1439_v8, %v4100_v24 }
 0x2c8   : > { %v1472_v18 = vmul.f32 %v1440_v61, %v4126_v12  ;;  %v1583_v31 = vld [vmem:[%s4001_s19 + $0xf0] sm:$0xff]  ;;  %v1456_v2 = vld [vmem:[%s3128_s27 + $0xf8] sm:$0xff]  ;;  %v1581_v33 = vld [vmem:[%s4001_s19 + $0xe0] sm:$0xff] }
 0x2c9   : > { %v1455_v28 = vld [vmem:[%s3128_s27 + $0xf0] sm:$0xff]  ;;  %v1584_v11 = vld [vmem:[%s4001_s19 + $0xf8] sm:$0xff]  ;;  %v1453_v3 = vld [vmem:[%s3128_s27 + $0xe0] sm:$0xff]  ;;  %v1488_v9 = vmul.f32 %v1456_v2, %v4112_v52  ;;  %s1796_s16 = scalar_lea.hbm %s4342_s8, %s2099_s18  ;;  %s2738_s11 = scalar_lea.hbm %s4342_s8, 512 }
 0x2ca   : > { %v1454_v24 = vld [vmem:[%s3128_s27 + $0xe8] sm:$0xff]  ;;  %v1487_v12 = vmul.f32 %v1455_v28, %v4095_v26  ;;  %v1485_v20 = vmul.f32 %v1453_v3, %v4057_v40  ;;  %s1797_s27 = sshll.u32 %s4015_s3, 4  ;;  %s1798_s27 = int_to_ptr.vmem [resolvable:$true] %s1797_s27 }
 0x2cb   : > { %v1582_v57 = vld [vmem:[%s4001_s19 + $0xe8] sm:$0xff]  ;;  %v1486_v26 = vmul.f32 %v1454_v24, %v4083_v38  ;;  %s1799_s19 = sshll.u32 %s1796_s16, 4  ;;  %s1800_s19 = int_to_ptr.hbm [resolvable:$true] %s1799_s19 }
 0x2cc   : > { %s2732_s18 = sshra.s32 %s1800_s19, 4  ;;  %s2733_s18 = int_to_ptr.hbm [resolvable:$true] %s2732_s18 }
 0x2cd   : > { %s2734_s5 = scalar_lea.hbm %s2733_s18, 128  ;;  %p2739_p13 = scmp.lt.s32.totalorder %s2733_s18, %s4342_s8 }
 0x2ce   : > { %p2735_p4 = scmp.ne.s32.totalorder %s2733_s18, %s2734_s5  ;;  %p2740_p9 = scmp.lt.s32.totalorder %s2738_s11, %s2734_s5 }
 0x2d0   : > { %p2736_p11 = pnand %p2735_p4, %p3074_p1  ;;  %p2741_p3 = por %p2740_p9, %p2739_p13 }
 0x2d2   : > { %p2737_p12 = pneg %p2736_p11 }
 0x2d4   : > { %p2742_p5 = pnand %p2741_p3, %p2737_p12 }
 0x2ef   : > { %v1510_v25 = vpop.permute.xlu1 %1509 }
 0x2f0   : > { %v1595_v22 = vmul.f32 %v1563_v63, %v1510_v25 }
 0x2f2   : > { %v1627_v58 = vadd.f32 %v1595_v22, %v1467_v60 }
 0x2f7   : > { %v1512_v48 = vpop.permute.xlu0 %1511 }
 0x2f8   : > { %v1596_v30 = vmul.f32 %v1564_v55, %v1512_v48  ;;  %v1514_v49 = vpop.permute.xlu2 %1513 }
 0x2f9   : > { %v1597_v0 = vmul.f32 %v1565_v6, %v1514_v49 }
 0x2fa   : > { %v1628_v14 = vadd.f32 %v1596_v30, %v1468_v44 }
 0x2fb   : > { %v1629_v45 = vadd.f32 %v1597_v0, %v1469_v15 }
 0x2fc   : > { %v2151_v37 = vpack.c.bf16 %v1628_v14, %v1627_v58 }
 0x2fe   : > { %2287 = vst [vmem:[%s4015_s3 + $0x28] sm:$0xff] %v2151_v37  }
 0x30e   : > { %v1546_v19 = vpop.permute.xlu1 %1545 }
 0x30f   : > { %v1613_v34 = vmul.f32 %v1581_v33, %v1546_v19 }
 0x311   : > { %v1645_v63 = vadd.f32 %v1613_v34, %v1485_v20 }
 0x318   : > { %v1516_v13 = vpop.permute.xlu1 %1515 }
 0x319   : > { %v1598_v50 = vmul.f32 %v1566_v43, %v1516_v13  ;;  %v1520_v62 = vpop.permute.xlu2 %1519 }
 0x31a   : > { %v1600_v51 = vmul.f32 %v1568_v53, %v1520_v62 }
 0x31b   : > { %v1630_v47 = vadd.f32 %v1598_v50, %v1470_v5 }
 0x31c   : > { %v1632_v39 = vadd.f32 %v1600_v51, %v1472_v18 }
 0x31d   : > { %v2156_v17 = vpack.c.bf16 %v1630_v47, %v1629_v45 }
 0x31f   : > { %2288 = vst [vmem:[%s4015_s3 + $0x30] sm:$0xff] %v2156_v17  }
 0x321   : > { %v1550_v32 = vpop.permute.xlu2 %1549 }
 0x322   : > { %v1615_v41 = vmul.f32 %v1583_v31, %v1550_v32 }
 0x324   : > { %v1647_v10 = vadd.f32 %v1615_v41, %v1487_v12 }
 0x329   : > { %v1518_v56 = vpop.permute.xlu0 %1517 }
 0x32a   : > { %v1599_v4 = vmul.f32 %v1567_v59, %v1518_v56 }
 0x32c   : > { %v1631_v46 = vadd.f32 %v1599_v4, %v1471_v16 }
 0x32d   : > { %v1552_v36 = vpop.permute.xlu1 %1551 }
 0x32e   : > { %v2161_v42 = vpack.c.bf16 %v1632_v39, %v1631_v46  ;;  %v1616_v54 = vmul.f32 %v1584_v11, %v1552_v36 }
 0x330   : > { %2289 = vst [vmem:[%s4015_s3 + $0x38] sm:$0xff] %v2161_v42   ;;  %v1648_v23 = vadd.f32 %v1616_v54, %v1488_v9 }
 0x331   : > { %v1548_v1 = vpop.permute.xlu0 %1547 }
 0x332   : > { %v1614_v52 = vmul.f32 %v1582_v57, %v1548_v1  ;;  %v2201_v27 = vpack.c.bf16 %v1648_v23, %v1647_v10 }
 0x334   : > { %v1646_v25 = vadd.f32 %v1614_v52, %v1486_v26  ;;  %2297 = vst [vmem:[%s4015_s3 + $0x78] sm:$0xff] %v2201_v27  }
 0x336   : > { %v2196_v29 = vpack.c.bf16 %v1646_v25, %v1645_v63 }
 0x338   : > { %2296 = vst [vmem:[%s4015_s3 + $0x70] sm:$0xff] %v2196_v29  }
 0x339   : > { %2745 = shalt.err (!%p2742_p5)
}
 0x33a   : > { %2343 = dma.vmem_to_hbm [thread:$0]  (%p3074_p1), %s1798_s27, 2048, %s1800_s19, %s1778_s15, %s2859_s10, %s2859_s10, %s2860_s12  }
 0x33b PF: > { %s4343_s22 = sld [smem:[#allocation21_spill]]  ;;  %p2376_p6 = scmp.ge.s32.totalorder %s2852_s7, 2 }
 0x33d   : > { %p2365_p8 = pnand %p2376_p6, %p2970_p7 }
 0x33f   : > { %p2366_p10 = pneg %p2365_p8 }
 0x341   : > { %s1833_s17 = sand.u32 1, %s4343_s22  }
 0x342   : > { %s1834_s14 = scalar_lea.sflag [#allocation4], %s1833_s17 }
 0x343   : > { %2803 = dma.done.wait (%p2366_p10), %s1834_s14, 2048  }
 0x344   : > { %2805 = vsyncadd (%p2366_p10), %s1834_s14, 4294965248  ;;  %s1844_s23 = scalar_lea.sflag [#allocation13], %s1833_s17 }
 0x345   : > { %2807 = dma.done.wait (%p2366_p10), %s1844_s23, 2048  }
 0x346   : > { %2809 = vsyncadd (%p2366_p10), %s1844_s23, 4294965248  ;;  %s30_s7 = sadd.s32 1, %s2852_s7   ;;  %s4345_s21 = sld [smem:[#allocation19_spill]] }
 0x347   : > { %p27_p0 = scmp.ge.s32.totalorder %s30_s7, 6   ;;  %s4346_s22 = sld [smem:[#allocation20_spill]] }
 0x348   : > { %s4347_s23 = sld [smem:[#allocation28_spill]]  ;;  %s4349_s24 = smov %s2828_s25 }
 0x349   : > { %s4348_s10 = sld [smem:[#allocation27_spill]]  ;;  %s4350_s25 = smov %s2832_s26 }
 0x34a   : > { %s4351_s26 = smov %s3086_s4  ;;  %s4352_s27 = smov %s2844_s29 }
 0x34b   : > { %s4353_s28 = smov %s2848_s30  ;;  %s4355_s30 = smov %s4361_s1 }
 0x34c   :  { %29 = sbr.rel (!%p27_p0) target bundleno = 21 (0x15), region = 134 }
 0x34f   : > { %s4354_s29 = smov %s4348_s10 }
 0x351   :  { %1850 = vsyncpa [#allocation3], 1 }
 0x352   :  { %1852 = vsyncpa [#allocation3 + $0x1], 1 }
 0x353   :  { %1853 = vsyncpa [#allocation6], 1 }
 0x354   :  { %1854 = vsyncpa [#allocation9], 1 }
 0x355   :  { %1856 = vsyncpa [#allocation9 + $0x1], 1 }
 0x356   :  { %1857 = vsyncpa [#allocation4], 1 }
 0x357   :  { %1859 = vsyncpa [#allocation4 + $0x1], 1 }
 0x358   :  { %1860 = vsyncpa [#allocation13], 1 }
 0x359   :  { %1862 = vsyncpa [#allocation13 + $0x1], 1 }

</bundles_post_ra>
